<compile_context>
chip_gen: v7x
topology: tpu7x:2x2x1
jax: 0.10.0
libtpu: 0.0.40
codegen_flags: <defaults>
</compile_context>

<pallas_src>
import functools

import jax
import jax.numpy as jnp
from jax.experimental import pallas as pl
from jax.experimental.pallas import tpu as pltpu

_EPS = 1e-8  # PyTorch F.cosine_similarity default eps

# Double-buffered input footprint cap: 4 streams x 2 buffers x block_b x D x 4B.
# 16 MiB => up to 4096 rows at D=128; double-buffered inputs then sit at <= 16 MiB.
_VMEM_INPUT_BUDGET_BYTES = 16 * 1024 * 1024
# Explicit scoped-VMEM limit: >= the default on v5e/v6e/v7x, << v7x's 64 MiB physical.
_VMEM_LIMIT_BYTES = 32 * 1024 * 1024
# Target rows per tile once the kernel is HBM-bound (amortizes per-step overhead).
_TARGET_ROWS = 2048


def _round_up(x, m):
    return ((x + m - 1) // m) * m


def _choose_block_b(B, D):
    # Budget with 4 bytes/elem regardless of input dtype so the in-kernel f32 copies of
    # bf16 inputs are also covered.
    max_rows = _VMEM_INPUT_BUDGET_BYTES // (4 * 2 * D * 4)
    max_rows = max(8, (max_rows // 8) * 8)
    blk = max(8, min(_TARGET_ROWS, max_rows, _round_up(B, 8)))
    # Cap so the grid has >= 2 steps whenever B > 8: lets v7x's megacore shard the
    # "parallel" axis across both TensorCores; a 2-step grid is ~free on v5e/v6e.
    half = max(8, _round_up(pl.cdiv(B, 2), 8))
    blk = min(blk, half)
    return max(8, (blk // 8) * 8)


def _orthogonal_loss_kernel(p_ref, ph_ref, g_ref, gh_ref, ones_ref, out_ref, *,
                            gamma, reduce_via_mxu):
    f32 = jnp.float32
    p = p_ref[...].astype(f32)
    ph = ph_ref[...].astype(f32)
    g = g_ref[...].astype(f32)
    gh = gh_ref[...].astype(f32)

    if reduce_via_mxu:
        # Lane reductions on the otherwise-idle MXU (vex slots) instead of XLU/VALU.
        # ones_ref is (D, 8) and resident in VMEM (constant block index); precision
        # HIGHEST keeps the f32 accumulation exact (no tf32-style truncation).
        ones = ones_ref[...]

        def rsum(x):
            r = jnp.dot(x, ones, preferred_element_type=f32,
                        precision=jax.lax.Precision.HIGHEST)
            return r[:, 0:1]
    else:
        def rsum(x):
            return jnp.sum(x, axis=-1, keepdims=True)

    # Hoisted inverse norms: each input's sum-of-squares is reduced exactly once and the
    # rsqrt (EUP) replaces sqrt+divide chains.  Reused across all five cosine terms.
    inv_p = jax.lax.rsqrt(jnp.maximum(rsum(p * p), _EPS * _EPS))
    inv_ph = jax.lax.rsqrt(jnp.maximum(rsum(ph * ph), _EPS * _EPS))
    inv_g = jax.lax.rsqrt(jnp.maximum(rsum(g * g), _EPS * _EPS))
    inv_gh = jax.lax.rsqrt(jnp.maximum(rsum(gh * gh), _EPS * _EPS))

    inv_eps = 1.0 / _EPS

    def abs_cos(num, inv_a, inv_b):
        # F.cosine_similarity: cos = num / max(||a||*||b||, eps)
        #                          = num * min(inv_a * inv_b, 1/eps)
        # (the per-norm eps^2 floor above only matters for exactly-zero vectors, where
        #  num == 0 anyway, so forward values match PyTorch).
        return jnp.abs(num * jnp.minimum(inv_a * inv_b, inv_eps))

    c_p_ph = abs_cos(rsum(p * ph), inv_p, inv_ph)
    c_g_gh = abs_cos(rsum(g * gh), inv_g, inv_gh)
    c_p_g = abs_cos(rsum(p * g), inv_p, inv_g)
    c_p_gh = abs_cos(rsum(p * gh), inv_p, inv_gh)
    c_g_ph = abs_cos(rsum(g * ph), inv_g, inv_ph)

    pos_pairs = (1.0 - c_p_ph) + (1.0 - c_g_gh)
    neg_pairs = c_p_g + c_p_gh + c_g_ph
    out_ref[...] = (pos_pairs + gamma * neg_pairs).astype(out_ref.dtype)


def orthogonal_loss(P, P_hat, G, G_hat, gamma=0.5, *, block_b=None,
                    reduce_via_mxu=True):
    B, D = P.shape
    if block_b is None:
        block_b = _choose_block_b(B, D)
    # Sanitize: multiple of 8, no larger than the (8-rounded) batch.
    block_b = max(8, (min(block_b, _round_up(B, 8)) // 8) * 8)
    grid_b = pl.cdiv(B, block_b)  # ragged last block handled by Pallas edge padding

    # MXU reduction constant, built once in the wrapper (not per grid step) and kept
    # resident in VMEM via a constant index_map.  Widened to 8 columns so the MXU
    # output tile is not a degenerate single-lane column; column 0 is used.
    ones = jnp.ones((D, 8), dtype=jnp.float32)

    in_spec = pl.BlockSpec((block_b, D), lambda i: (i, 0))
    ones_spec = pl.BlockSpec((D, 8), lambda i: (0, 0))
    out_spec = pl.BlockSpec((block_b, 1), lambda i: (i, 0))

    kernel = functools.partial(_orthogonal_loss_kernel, gamma=float(gamma),
                               reduce_via_mxu=reduce_via_mxu)

    out = pl.pallas_call(
        kernel,
        out_shape=jax.ShapeDtypeStruct((B, 1), jnp.float32),
        grid_spec=pltpu.PrefetchScalarGridSpec(
            num_scalar_prefetch=0,
            grid=(grid_b,),
            in_specs=[in_spec, in_spec, in_spec, in_spec, ones_spec],
            out_specs=out_spec,
        ),
        compiler_params=pltpu.CompilerParams(
            dimension_semantics=("parallel",),
            vmem_limit_bytes=_VMEM_LIMIT_BYTES,
        ),
    )(P, P_hat, G, G_hat, ones)
    # glue: (B, 1) -> (B,) to match PyTorch's output shape exactly
    return out[:, 0]


def _reference(P, P_hat, G, G_hat, gamma=0.5):
    # Mirrors F.cosine_similarity: denominator product clamped at eps.
    def cos(a, b):
        num = jnp.sum(a * b, axis=1)
        denom = jnp.maximum(
            jnp.linalg.norm(a, axis=1) * jnp.linalg.norm(b, axis=1), _EPS)
        return num / denom

    pos = (1 - jnp.abs(cos(P, P_hat))) + (1 - jnp.abs(cos(G, G_hat)))
    neg = jnp.abs(cos(P, G)) + jnp.abs(cos(P, G_hat)) + jnp.abs(cos(G, P_hat))
    return pos + gamma * neg


if __name__ == "__main__":
    ks = jax.random.split(jax.random.PRNGKey(0), 8)

    # Case 1: single-tile small batch (batch=8, feature dim=128), default MXU reductions.
    B, D = 8, 128
    P = jax.random.normal(ks[0], (B, D), dtype=jnp.float32)
    P_hat = jax.random.normal(ks[1], (B, D), dtype=jnp.float32)
    G = jax.random.normal(ks[2], (B, D), dtype=jnp.float32)
    G_hat = jax.random.normal(ks[3], (B, D), dtype=jnp.float32)

    loss = orthogonal_loss(P, P_hat, G, G_hat, gamma=0.5)
    jax.block_until_ready(loss)
    ref = _reference(P, P_hat, G, G_hat, gamma=0.5)
    assert loss.shape == (B,)
    # MXU multi-pass f32 rounding can differ from jnp.sum by a few ULP -> 1e-4 tol.
    assert jnp.allclose(loss, ref, atol=1e-4, rtol=1e-4)

    # Case 2: default block choice on batch=32 -> block_b=16, 2-step "parallel" grid
    # (v7x megacore-friendly), resident ones block reused across steps.
    B2, D2 = 32, 128
    P2 = jax.random.normal(ks[4], (B2, D2), dtype=jnp.float32)
    P2_hat = jax.random.normal(ks[5], (B2, D2), dtype=jnp.float32)
    G2 = jax.random.normal(ks[6], (B2, D2), dtype=jnp.float32)
    G2_hat = jax.random.normal(ks[7], (B2, D2), dtype=jnp.float32)

    loss2 = orthogonal_loss(P2, P2_hat, G2, G2_hat, gamma=0.5)
    jax.block_until_ready(loss2)
    ref2 = _reference(P2, P2_hat, G2, G2_hat, gamma=0.5)
    assert loss2.shape == (B2,)
    assert jnp.allclose(loss2, ref2, atol=1e-4, rtol=1e-4)

    # Case 3: multi-block grid (block_b=8 -> 4 steps) on the XLU reduction path, tight tol.
    loss3 = orthogonal_loss(P2, P2_hat, G2, G2_hat, gamma=0.5, block_b=8,
                            reduce_via_mxu=False)
    jax.block_until_ready(loss3)
    assert loss3.shape == (B2,)
    assert jnp.allclose(loss3, ref2, atol=1e-5, rtol=1e-5)

    print("KERNEL_OK")
</pallas_src>

<mosaic_0001>
module attributes {stable_mosaic.version = 11 : i64} {
  func.func @_orthogonal_loss_kernel(%arg0: i32, %arg1: memref<8x128xf32, #tpu.memory_space<vmem>>, %arg2: memref<8x128xf32, #tpu.memory_space<vmem>>, %arg3: memref<8x128xf32, #tpu.memory_space<vmem>>, %arg4: memref<8x128xf32, #tpu.memory_space<vmem>>, %arg5: memref<128x8xf32, #tpu.memory_space<vmem>>, %arg6: memref<8x1xf32, #tpu.memory_space<vmem>>) attributes {dimension_semantics = [#tpu.dimension_semantics<parallel>], iteration_bounds = array<i64: 1>, scalar_prefetch = 0 : i64, scratch_operands = 0 : i64, tpu.core_type = #tpu.core_type<tc>, window_params = [{transform_indices = @transform_0, window_bounds = array<i64: 8, 128>}, {transform_indices = @transform_1, window_bounds = array<i64: 8, 128>}, {transform_indices = @transform_2, window_bounds = array<i64: 8, 128>}, {transform_indices = @transform_3, window_bounds = array<i64: 8, 128>}, {pipeline_mode = #tpu.pipeline_mode<synchronous>, transform_indices = @transform_4, window_bounds = array<i64: 128, 8>}, {transform_indices = @transform_5, window_bounds = array<i64: 8, 1>}]} {
    %c0 = arith.constant 0 : index
    %c0_0 = arith.constant 0 : index
    %0 = vector.load %arg1[%c0, %c0_0] : memref<8x128xf32, #tpu.memory_space<vmem>>, vector<8x128xf32>
    %c0_1 = arith.constant 0 : index
    %c0_2 = arith.constant 0 : index
    %1 = vector.load %arg2[%c0_1, %c0_2] : memref<8x128xf32, #tpu.memory_space<vmem>>, vector<8x128xf32>
    %c0_3 = arith.constant 0 : index
    %c0_4 = arith.constant 0 : index
    %2 = vector.load %arg3[%c0_3, %c0_4] : memref<8x128xf32, #tpu.memory_space<vmem>>, vector<8x128xf32>
    %c0_5 = arith.constant 0 : index
    %c0_6 = arith.constant 0 : index
    %3 = vector.load %arg4[%c0_5, %c0_6] : memref<8x128xf32, #tpu.memory_space<vmem>>, vector<8x128xf32>
    %c0_7 = arith.constant 0 : index
    %c0_8 = arith.constant 0 : index
    %4 = vector.load %arg5[%c0_7, %c0_8] : memref<128x8xf32, #tpu.memory_space<vmem>>, vector<128x8xf32>
    %5 = arith.mulf %0, %0 : vector<8x128xf32>
    %cst = arith.constant dense<0.000000e+00> : vector<8x8xf32>
    %6 = tpu.matmul %5, %4, %cst {dimension_numbers = #tpu.dot_dimension_numbers<[1], [0], [0], [1], [0, 0, 1, 1], [], []>, precision = #tpu.contract_precision<fp32>} : vector<8x128xf32>, vector<128x8xf32>, vector<8x8xf32> -> vector<8x8xf32>
    %7 = vector.extract_strided_slice %6 {offsets = [0, 0], sizes = [8, 1], strides = [1, 1]} : vector<8x8xf32> to vector<8x1xf32>
    %cst_9 = arith.constant 1.000000e-16 : f32
    %8 = vector.broadcast %cst_9 : f32 to vector<8x1xf32>
    %9 = arith.maximumf %7, %8 : vector<8x1xf32>
    %10 = math.rsqrt %9 : vector<8x1xf32>
    %11 = arith.mulf %1, %1 : vector<8x128xf32>
    %cst_10 = arith.constant dense<0.000000e+00> : vector<8x8xf32>
    %12 = tpu.matmul %11, %4, %cst_10 {dimension_numbers = #tpu.dot_dimension_numbers<[1], [0], [0], [1], [0, 0, 1, 1], [], []>, precision = #tpu.contract_precision<fp32>} : vector<8x128xf32>, vector<128x8xf32>, vector<8x8xf32> -> vector<8x8xf32>
    %13 = vector.extract_strided_slice %12 {offsets = [0, 0], sizes = [8, 1], strides = [1, 1]} : vector<8x8xf32> to vector<8x1xf32>
    %cst_11 = arith.constant 1.000000e-16 : f32
    %14 = vector.broadcast %cst_11 : f32 to vector<8x1xf32>
    %15 = arith.maximumf %13, %14 : vector<8x1xf32>
    %16 = math.rsqrt %15 : vector<8x1xf32>
    %17 = arith.mulf %2, %2 : vector<8x128xf32>
    %cst_12 = arith.constant dense<0.000000e+00> : vector<8x8xf32>
    %18 = tpu.matmul %17, %4, %cst_12 {dimension_numbers = #tpu.dot_dimension_numbers<[1], [0], [0], [1], [0, 0, 1, 1], [], []>, precision = #tpu.contract_precision<fp32>} : vector<8x128xf32>, vector<128x8xf32>, vector<8x8xf32> -> vector<8x8xf32>
    %19 = vector.extract_strided_slice %18 {offsets = [0, 0], sizes = [8, 1], strides = [1, 1]} : vector<8x8xf32> to vector<8x1xf32>
    %cst_13 = arith.constant 1.000000e-16 : f32
    %20 = vector.broadcast %cst_13 : f32 to vector<8x1xf32>
    %21 = arith.maximumf %19, %20 : vector<8x1xf32>
    %22 = math.rsqrt %21 : vector<8x1xf32>
    %23 = arith.mulf %3, %3 : vector<8x128xf32>
    %cst_14 = arith.constant dense<0.000000e+00> : vector<8x8xf32>
    %24 = tpu.matmul %23, %4, %cst_14 {dimension_numbers = #tpu.dot_dimension_numbers<[1], [0], [0], [1], [0, 0, 1, 1], [], []>, precision = #tpu.contract_precision<fp32>} : vector<8x128xf32>, vector<128x8xf32>, vector<8x8xf32> -> vector<8x8xf32>
    %25 = vector.extract_strided_slice %24 {offsets = [0, 0], sizes = [8, 1], strides = [1, 1]} : vector<8x8xf32> to vector<8x1xf32>
    %cst_15 = arith.constant 1.000000e-16 : f32
    %26 = vector.broadcast %cst_15 : f32 to vector<8x1xf32>
    %27 = arith.maximumf %25, %26 : vector<8x1xf32>
    %28 = math.rsqrt %27 : vector<8x1xf32>
    %29 = arith.mulf %0, %1 : vector<8x128xf32>
    %cst_16 = arith.constant dense<0.000000e+00> : vector<8x8xf32>
    %30 = tpu.matmul %29, %4, %cst_16 {dimension_numbers = #tpu.dot_dimension_numbers<[1], [0], [0], [1], [0, 0, 1, 1], [], []>, precision = #tpu.contract_precision<fp32>} : vector<8x128xf32>, vector<128x8xf32>, vector<8x8xf32> -> vector<8x8xf32>
    %31 = vector.extract_strided_slice %30 {offsets = [0, 0], sizes = [8, 1], strides = [1, 1]} : vector<8x8xf32> to vector<8x1xf32>
    %32 = arith.mulf %10, %16 : vector<8x1xf32>
    %cst_17 = arith.constant 1.000000e+08 : f32
    %33 = vector.broadcast %cst_17 : f32 to vector<8x1xf32>
    %34 = arith.minimumf %32, %33 : vector<8x1xf32>
    %35 = arith.mulf %31, %34 : vector<8x1xf32>
    %36 = math.absf %35 : vector<8x1xf32>
    %37 = arith.mulf %2, %3 : vector<8x128xf32>
    %cst_18 = arith.constant dense<0.000000e+00> : vector<8x8xf32>
    %38 = tpu.matmul %37, %4, %cst_18 {dimension_numbers = #tpu.dot_dimension_numbers<[1], [0], [0], [1], [0, 0, 1, 1], [], []>, precision = #tpu.contract_precision<fp32>} : vector<8x128xf32>, vector<128x8xf32>, vector<8x8xf32> -> vector<8x8xf32>
    %39 = vector.extract_strided_slice %38 {offsets = [0, 0], sizes = [8, 1], strides = [1, 1]} : vector<8x8xf32> to vector<8x1xf32>
    %40 = arith.mulf %22, %28 : vector<8x1xf32>
    %cst_19 = arith.constant 1.000000e+08 : f32
    %41 = vector.broadcast %cst_19 : f32 to vector<8x1xf32>
    %42 = arith.minimumf %40, %41 : vector<8x1xf32>
    %43 = arith.mulf %39, %42 : vector<8x1xf32>
    %44 = math.absf %43 : vector<8x1xf32>
    %45 = arith.mulf %0, %2 : vector<8x128xf32>
    %cst_20 = arith.constant dense<0.000000e+00> : vector<8x8xf32>
    %46 = tpu.matmul %45, %4, %cst_20 {dimension_numbers = #tpu.dot_dimension_numbers<[1], [0], [0], [1], [0, 0, 1, 1], [], []>, precision = #tpu.contract_precision<fp32>} : vector<8x128xf32>, vector<128x8xf32>, vector<8x8xf32> -> vector<8x8xf32>
    %47 = vector.extract_strided_slice %46 {offsets = [0, 0], sizes = [8, 1], strides = [1, 1]} : vector<8x8xf32> to vector<8x1xf32>
    %48 = arith.mulf %10, %22 : vector<8x1xf32>
    %cst_21 = arith.constant 1.000000e+08 : f32
    %49 = vector.broadcast %cst_21 : f32 to vector<8x1xf32>
    %50 = arith.minimumf %48, %49 : vector<8x1xf32>
    %51 = arith.mulf %47, %50 : vector<8x1xf32>
    %52 = math.absf %51 : vector<8x1xf32>
    %53 = arith.mulf %0, %3 : vector<8x128xf32>
    %cst_22 = arith.constant dense<0.000000e+00> : vector<8x8xf32>
    %54 = tpu.matmul %53, %4, %cst_22 {dimension_numbers = #tpu.dot_dimension_numbers<[1], [0], [0], [1], [0, 0, 1, 1], [], []>, precision = #tpu.contract_precision<fp32>} : vector<8x128xf32>, vector<128x8xf32>, vector<8x8xf32> -> vector<8x8xf32>
    %55 = vector.extract_strided_slice %54 {offsets = [0, 0], sizes = [8, 1], strides = [1, 1]} : vector<8x8xf32> to vector<8x1xf32>
    %56 = arith.mulf %10, %28 : vector<8x1xf32>
    %cst_23 = arith.constant 1.000000e+08 : f32
    %57 = vector.broadcast %cst_23 : f32 to vector<8x1xf32>
    %58 = arith.minimumf %56, %57 : vector<8x1xf32>
    %59 = arith.mulf %55, %58 : vector<8x1xf32>
    %60 = math.absf %59 : vector<8x1xf32>
    %61 = arith.mulf %2, %1 : vector<8x128xf32>
    %cst_24 = arith.constant dense<0.000000e+00> : vector<8x8xf32>
    %62 = tpu.matmul %61, %4, %cst_24 {dimension_numbers = #tpu.dot_dimension_numbers<[1], [0], [0], [1], [0, 0, 1, 1], [], []>, precision = #tpu.contract_precision<fp32>} : vector<8x128xf32>, vector<128x8xf32>, vector<8x8xf32> -> vector<8x8xf32>
    %63 = vector.extract_strided_slice %62 {offsets = [0, 0], sizes = [8, 1], strides = [1, 1]} : vector<8x8xf32> to vector<8x1xf32>
    %64 = arith.mulf %22, %16 : vector<8x1xf32>
    %cst_25 = arith.constant 1.000000e+08 : f32
    %65 = vector.broadcast %cst_25 : f32 to vector<8x1xf32>
    %66 = arith.minimumf %64, %65 : vector<8x1xf32>
    %67 = arith.mulf %63, %66 : vector<8x1xf32>
    %68 = math.absf %67 : vector<8x1xf32>
    %cst_26 = arith.constant 1.000000e+00 : f32
    %69 = vector.broadcast %cst_26 : f32 to vector<8x1xf32>
    %70 = arith.subf %69, %36 : vector<8x1xf32>
    %cst_27 = arith.constant 1.000000e+00 : f32
    %71 = vector.broadcast %cst_27 : f32 to vector<8x1xf32>
    %72 = arith.subf %71, %44 : vector<8x1xf32>
    %73 = arith.addf %70, %72 : vector<8x1xf32>
    %74 = arith.addf %52, %60 : vector<8x1xf32>
    %75 = arith.addf %74, %68 : vector<8x1xf32>
    %cst_28 = arith.constant 5.000000e-01 : f32
    %76 = vector.broadcast %cst_28 : f32 to vector<8x1xf32>
    %77 = arith.mulf %76, %75 : vector<8x1xf32>
    %78 = arith.addf %73, %77 : vector<8x1xf32>
    %c0_29 = arith.constant 0 : index
    %c0_30 = arith.constant 0 : index
    %79 = vector.load %arg6[%c0_29, %c0_30] : memref<8x1xf32, #tpu.memory_space<vmem>>, vector<8x1xf32>
    tpu.vector_store %arg6[%c0_29, %c0_30], %78 {strides = array<i32>} : memref<8x1xf32, #tpu.memory_space<vmem>>, vector<8x1xf32>,
    return
  }
  func.func @transform_0(%arg0: i32) -> (i32, i32) {
    %c0_i32 = arith.constant 0 : i32
    %c0_i32_0 = arith.constant 0 : i32
    return %arg0, %c0_i32 : i32, i32
  }
  func.func @transform_1(%arg0: i32) -> (i32, i32) {
    %c0_i32 = arith.constant 0 : i32
    %c0_i32_0 = arith.constant 0 : i32
    return %arg0, %c0_i32 : i32, i32
  }
  func.func @transform_2(%arg0: i32) -> (i32, i32) {
    %c0_i32 = arith.constant 0 : i32
    %c0_i32_0 = arith.constant 0 : i32
    return %arg0, %c0_i32 : i32, i32
  }
  func.func @transform_3(%arg0: i32) -> (i32, i32) {
    %c0_i32 = arith.constant 0 : i32
    %c0_i32_0 = arith.constant 0 : i32
    return %arg0, %c0_i32 : i32, i32
  }
  func.func @transform_4(%arg0: i32) -> (i32, i32) {
    %c0_i32 = arith.constant 0 : i32
    %c0_i32_0 = arith.constant 0 : i32
    %c0_i32_1 = arith.constant 0 : i32
    return %c0_i32, %c0_i32_0 : i32, i32
  }
  func.func @transform_5(%arg0: i32) -> (i32, i32) {
    %c0_i32 = arith.constant 0 : i32
    %c0_i32_0 = arith.constant 0 : i32
    return %arg0, %c0_i32 : i32, i32
  }
}

</mosaic_0001>

<bundles_post_ra>
// kernel: tpu_custom_call.1
= control target key start
LH: loop header
LB: loop body
LE: loop exit
PB: predicated region body
PF: predicated region fallthrough
CT: control target
= control target key end

     0   :  { %v10066_v0 = vmov 0.0|0.0   ;;  %vm10067_vm0 = vmmov 0   ;;  %v10068_v8 = vmov 0.0   ;;  %vm5853_vm1 = vcmask 7168   ;;  %s11559_s4 = inlined_call_operand.vmem [shape: f32[128,8], index: 4, kind: input, shape index: {}]   ;;  %s11560_s0 = inlined_call_operand.vmem [shape: f32[8,128], index: 0, kind: input, shape index: {}]   ;;  %s11561_s1 = inlined_call_operand.vmem [shape: f32[8,128], index: 1, kind: input, shape index: {}]   ;;  %s11562_s2 = inlined_call_operand.vmem [shape: f32[8,128], index: 2, kind: input, shape index: {}]   ;;  %s11563_s3 = inlined_call_operand.vmem [shape: f32[8,128], index: 3, kind: input, shape index: {}]   ;;  %s11564_s5 = inlined_call_operand.vmem [shape: f32[8,1], index: 5, kind: output, shape index: {}]  }
   0x1   :  { %8667 = vmatprep.subr.bf16.mxu1 %v10066_v0  ;;  %8739 = vmatprep.subr.bf16.mxu0 %v10066_v0  ;;  %v24_v1 = vld [vmem:[%s11559_s4] sm:$0xff]  ;;  %v25_v2 = vld [vmem:[%s11559_s4 + $0x8] sm:$0xff]  ;;  %v26_v3 = vld [vmem:[%s11559_s4 + $0x10] sm:$0xff] }
   0x2   :  { %v42_v4 = vand.u32 4294901760, %v24_v1  ;;  %v45_v5 = vand.u32 4294901760, %v25_v2  ;;  %v27_v6 = vld [vmem:[%s11559_s4 + $0x18] sm:$0xff]  ;;  %v48_v7 = vand.u32 4294901760, %v26_v3  ;;  %6809 = vmatprep.mubr.msk.f32.mxu1 %vm10067_vm0, %v10068_v8  ;;  %6914 = vmatprep.mubr.msk.f32.mxu0 %vm10067_vm0, %v10068_v8  ;;  %v28_v10 = vld [vmem:[%s11559_s4 + $0x20] sm:$0xff]  ;;  %v10123_v11 = vld [vmem:[%s11559_s4 + $0x28] sm:$0xff] }
   0x3   :  { %v51_v9 = vand.u32 4294901760, %v27_v6  ;;  %v54_v14 = vand.u32 4294901760, %v28_v10  ;;  %v57_v15 = vand.u32 4294901760, %v10123_v11  ;;  %v10137_v16 = vld [vmem:[%s11559_s4 + $0x30] sm:$0xff]  ;;  %v10142_v17 = vld [vmem:[%s11559_s4 + $0x38] sm:$0xff]  ;;  %v10155_v21 = vld [vmem:[%s11560_s0] sm:$0xff] }
   0x4   :  { %v10125_v12 = vpack.c.bf16 %v45_v5, %v42_v4  ;;  %v60_v19 = vand.u32 4294901760, %v10137_v16  ;;  %v63_v20 = vand.u32 4294901760, %v10142_v17  ;;  %v10162_v22 = vld [vmem:[%s11559_s4 + $0x40] sm:$0xff]  ;;  %v10167_v23 = vld [vmem:[%s11559_s4 + $0x48] sm:$0xff]  ;;  %v40_v24 = vmul.f32 %v10155_v21, %v10155_v21  ;;  %v10182_v28 = vld [vmem:[%s11559_s4 + $0x50] sm:$0xff] }
   0x5   :  { %v10129_v13 = vpack.c.bf16 %v51_v9, %v48_v7  ;;  %v10148_v18 = vpack.c.bf16 %v57_v15, %v54_v14  ;;  %v66_v26 = vand.u32 4294901760, %v10162_v22  ;;  %v69_v27 = vand.u32 4294901760, %v10167_v23  ;;  %v10189_v29 = vld [vmem:[%s11559_s4 + $0x58] sm:$0xff]  ;;  %v10206_v34 = vld [vmem:[%s11559_s4 + $0x60] sm:$0xff]  ;;  %v10211_v35 = vld [vmem:[%s11559_s4 + $0x68] sm:$0xff] }
   0x6   :  { %8669 = vmatpush3.bf16.msra.mxu1 %v10125_v12  ;;  %8741 = vmatpush3.bf16.msra.mxu0 %v10125_v12  ;;  %v10175_v25 = vpack.c.bf16 %v63_v20, %v60_v19  ;;  %v72_v30 = vand.u32 4294901760, %v10182_v28  ;;  %v10192_v31 = vand.u32 4294901760, %v40_v24  ;;  %v75_v33 = vand.u32 4294901760, %v10189_v29  ;;  %v10226_v41 = vld [vmem:[%s11559_s4 + $0x70] sm:$0xff]  ;;  %v10244_v45 = vld [vmem:[%s11559_s4 + $0x78] sm:$0xff] }
   0x7   :  { %8670 = vmatprep.subr.bf16.mxu1 %v10066_v0  ;;  %8742 = vmatprep.subr.bf16.mxu0 %v10066_v0  ;;  %v10200_v32 = vpack.c.bf16 %v69_v27, %v66_v26  ;;  %v10213_v36 = vsub.f32 %v24_v1, %v42_v4  ;;  %v10215_v37 = vsub.f32 %v25_v2, %v45_v5  ;;  %v78_v39 = vand.u32 4294901760, %v10206_v34 }
   0x8   :  { %v10219_v38 = vsub.f32 %v26_v3, %v48_v7  ;;  %v81_v40 = vand.u32 4294901760, %v10211_v35  ;;  %v10229_v42 = vsub.f32 %v40_v24, %v10192_v31  ;;  %v10231_v43 = vsub.f32 %v27_v6, %v51_v9 }
   0x9   :  { %v10239_v44 = vpack.c.bf16 %v75_v33, %v72_v30  ;;  %v135_v46 = vand.u32 4294901760, %v10213_v36  ;;  %v142_v47 = vand.u32 4294901760, %v10215_v37  ;;  %v84_v48 = vand.u32 4294901760, %v10226_v41 }
   0xa   :  { %8672 = vmatpush3.bf16.msra.mxu1 %v10129_v13  ;;  %8744 = vmatpush3.bf16.msra.mxu0 %v10129_v13  ;;  %v149_v49 = vand.u32 4294901760, %v10219_v38  ;;  %v10252_v50 = vsub.f32 %v28_v10, %v54_v14  ;;  %v10258_v51 = vpack.c.bf16 %v81_v40, %v78_v39  ;;  %v87_v52 = vand.u32 4294901760, %v10244_v45 }
   0xb   :  { %8673 = vmatprep.subr.bf16.mxu1 %v10066_v0  ;;  %8745 = vmatprep.subr.bf16.mxu0 %v10066_v0  ;;  %v124_v53 = vand.u32 4294901760, %v10229_v42  ;;  %v156_v54 = vand.u32 4294901760, %v10231_v43  ;;  %v136_v55 = vsub.f32 %v10213_v36, %v135_v46  ;;  %v143_v56 = vsub.f32 %v10215_v37, %v142_v47 }
   0xc   :  { %v10270_v57 = vsub.f32 %v10123_v11, %v57_v15  ;;  %v150_v58 = vsub.f32 %v10219_v38, %v149_v49  ;;  %v163_v59 = vand.u32 4294901760, %v10252_v50  ;;  %v10280_v60 = vpack.c.bf16 %v87_v52, %v84_v48 }
   0xd   :  { %v125_v61 = vsub.f32 %v10229_v42, %v124_v53  ;;  %v157_v62 = vsub.f32 %v10231_v43, %v156_v54  ;;  %v10285_v63 = vsub.f32 %v10137_v16, %v60_v19  ;;  %v137_v1 = vand.u32 4294901760, %v136_v55 }
   0xe   :  { %8675 = vmatpush3.bf16.msra.mxu1 %v10148_v18  ;;  %8747 = vmatpush3.bf16.msra.mxu0 %v10148_v18  ;;  %v144_v2 = vand.u32 4294901760, %v143_v56  ;;  %v170_v3 = vand.u32 4294901760, %v10270_v57  ;;  %v10293_v4 = vsub.f32 %v10142_v17, %v63_v20  ;;  %v10297_v5 = vpack.c.bf16 %v142_v47, %v135_v46 }
   0xf   :  { %8676 = vmatprep.subr.bf16.mxu1 %v10066_v0  ;;  %8748 = vmatprep.subr.bf16.mxu0 %v10066_v0  ;;  %v151_v6 = vand.u32 4294901760, %v150_v58  ;;  %v164_v7 = vsub.f32 %v10252_v50, %v163_v59  ;;  %v126_v9 = vand.u32 4294901760, %v125_v61  ;;  %v158_v10 = vand.u32 4294901760, %v157_v62 }
  0x10   :  { %v10303_v11 = vsub.f32 %v10162_v22, %v66_v26  ;;  %v10308_v14 = vsub.f32 %v10167_v23, %v69_v27  ;;  %v10312_v15 = vpack.c.bf16 %v144_v2, %v137_v1  ;;  %v171_v16 = vsub.f32 %v10270_v57, %v170_v3 }
  0x11   :  { %v177_v17 = vand.u32 4294901760, %v10285_v63  ;;  %v184_v19 = vand.u32 4294901760, %v10293_v4  ;;  %v10319_v20 = vpack.c.bf16 %v156_v54, %v149_v49  ;;  %v165_v22 = vand.u32 4294901760, %v164_v7 }
  0x12   :  { %8678 = vmatpush3.bf16.msra.mxu1 %v10175_v25  ;;  %8750 = vmatpush3.bf16.msra.mxu0 %v10175_v25  ;;  %v191_v23 = vand.u32 4294901760, %v10303_v11  ;;  %v198_v24 = vand.u32 4294901760, %v10308_v14  ;;  %v10326_v26 = vsub.f32 %v10182_v28, %v72_v30  ;;  %v10331_v27 = vsub.f32 %v10189_v29, %v75_v33 }
  0x13   :  { %8679 = vmatprep.subr.bf16.mxu1 %v10066_v0  ;;  %8751 = vmatprep.subr.bf16.mxu0 %v10066_v0  ;;  %v10335_v46 = vpack.c.bf16 %v158_v10, %v151_v6  ;;  %v172_v47 = vand.u32 4294901760, %v171_v16  ;;  %v178_v49 = vsub.f32 %v10285_v63, %v177_v17  ;;  %v10341_v28 = vpack.c.bf16 %v170_v3, %v163_v59 }
  0x14   :  { %v10346_v29 = vsub.f32 %v10206_v34, %v78_v39  ;;  %v192_v30 = vsub.f32 %v10303_v11, %v191_v23  ;;  %v199_v33 = vsub.f32 %v10308_v14, %v198_v24  ;;  %v205_v54 = vand.u32 4294901760, %v10326_v26 }
  0x15   :  { %v212_v55 = vand.u32 4294901760, %v10331_v27  ;;  %v10358_v34 = vpack.c.bf16 %v172_v47, %v165_v22  ;;  %v179_v39 = vand.u32 4294901760, %v178_v49  ;;  %v10363_v58 = vsub.f32 %v10211_v35, %v81_v40 }
  0x16   :  { %8681 = vmatpush3.bf16.msra.mxu1 %v10200_v32  ;;  %8753 = vmatpush3.bf16.msra.mxu0 %v10200_v32  ;;  %v10367_v59 = vpack.c.bf16 %v184_v19, %v177_v17  ;;  %v219_v61 = vand.u32 4294901760, %v10346_v29  ;;  %v193_v62 = vand.u32 4294901760, %v192_v30  ;;  %v200_v1 = vand.u32 4294901760, %v199_v33 }
  0x17   :  { %8682 = vmatprep.subr.bf16.mxu1 %v10066_v0  ;;  %8754 = vmatprep.subr.bf16.mxu0 %v10066_v0  ;;  %v206_v2 = vsub.f32 %v10326_v26, %v205_v54  ;;  %v213_v3 = vsub.f32 %v10331_v27, %v212_v55  ;;  %v226_v40 = vand.u32 4294901760, %v10363_v58  ;;  %v10380_v6 = vsub.f32 %v10226_v41, %v84_v48 }
  0x18   :  { %v10385_v7 = vsub.f32 %v10244_v45, %v87_v52  ;;  %v220_v17 = vsub.f32 %v10346_v29, %v219_v61  ;;  %v10394_v41 = vpack.c.bf16 %v200_v1, %v193_v62 }
  0x19   :  { %v207_v10 = vand.u32 4294901760, %v206_v2  ;;  %v214_v16 = vand.u32 4294901760, %v213_v3  ;;  %v227_v48 = vsub.f32 %v10363_v58, %v226_v40  ;;  %v233_v45 = vand.u32 4294901760, %v10380_v6 }
  0x1a   :  { %8684 = vmatpush3.bf16.msra.mxu1 %v10239_v44  ;;  %8756 = vmatpush3.bf16.msra.mxu0 %v10239_v44  ;;  %v240_v52 = vand.u32 4294901760, %v10385_v7  ;;  %v221_v22 = vand.u32 4294901760, %v220_v17  ;;  %v10415_v30 = vpack.c.bf16 %v226_v40, %v219_v61  ;;  %v10441_v61 = vpack.c.bf16 %v10231_v43, %v10219_v38  ;;  %v10776_v40 = vld [vmem:[%s11563_s3] sm:$0xff] }
  0x1b   :  { %8685 = vmatprep.subr.bf16.mxu1 %v10066_v0  ;;  %8757 = vmatprep.subr.bf16.mxu0 %v10066_v0  ;;  %v234_v47 = vsub.f32 %v10380_v6, %v233_v45  ;;  %v10469_v38 = vpack.c.bf16 %v10308_v14, %v10303_v11  ;;  %v10477_v43 = vpack.c.bf16 %v10331_v27, %v10326_v26 }
  0x1c   :  { %v241_v49 = vsub.f32 %v10385_v7, %v240_v52 }
  0x1d   :  { %v235_v33 = vand.u32 4294901760, %v234_v47 }
  0x1e   :  { %8687 = vmatpush3.bf16.msra.mxu1 %v10258_v51  ;;  %8759 = vmatpush3.bf16.msra.mxu0 %v10258_v51 }
  0x1f   :  { %8688 = vmatprep.subr.bf16.mxu1 %v10066_v0  ;;  %8760 = vmatprep.subr.bf16.mxu0 %v10066_v0 }
  0x22   :  { %8690 = vmatpush3.bf16.msra.mxu1 %v10280_v60  ;;  %8762 = vmatpush3.bf16.msra.mxu0 %v10280_v60 }
  0x23   :  { %8691 = vmatprep.subr.bf16.mxu1 %v10066_v0  ;;  %8763 = vmatprep.subr.bf16.mxu0 %v10066_v0 }
  0x25   :  { %6810 = vmatmul.mubr.f32.vlgmr.msra.gmra.mrb[0].mxu1 %v126_v9  ;;  %6915 = vmatmul.mubr.f32.vlgmr.msra.gmra.mrb[0].mxu0 %v124_v53  ;;  %v185_v53 = vsub.f32 %v10293_v4, %v184_v19  ;;  %v10389_v9 = vpack.c.bf16 %v198_v24, %v191_v23  ;;  %v10401_v19 = vpack.c.bf16 %v212_v55, %v205_v54  ;;  %v228_v24 = vand.u32 4294901760, %v227_v48 }
  0x26   :  { %8693 = vmatpush3.bf16.msra.mxu1 %v10312_v15  ;;  %8765 = vmatpush3.bf16.msra.mxu0 %v10297_v5  ;;  %v10405_v23 = vpack.c.bf16 %v214_v16, %v207_v10  ;;  %v242_v54 = vand.u32 4294901760, %v241_v49 }
  0x27   :  { %8694 = vmatprep.subr.bf16.mxu1 %v10066_v0  ;;  %8766 = vmatprep.subr.bf16.mxu0 %v10066_v0  ;;  %v186_v56 = vand.u32 4294901760, %v185_v53  ;;  %v10413_v53 = vpack.c.bf16 %v228_v24, %v221_v22 }
  0x28   :  { %6844 = vmatprep.mubr.msk.f32.mxu1 %vm10067_vm0, %v10068_v8  ;;  %6949 = vmatprep.mubr.msk.f32.mxu0 %vm10067_vm0, %v10068_v8  ;;  %v10421_v55 = vpack.c.bf16 %v242_v54, %v235_v33 }
  0x29   :  { %v10374_v35 = vpack.c.bf16 %v186_v56, %v179_v39  ;;  %v10423_v39 = vpack.c.bf16 %v240_v52, %v233_v45  ;;  %v10431_v56 = vpack.c.bf16 %v10215_v37, %v10213_v36  ;;  %v10453_v36 = vpack.c.bf16 %v10270_v57, %v10252_v50 }
  0x2a   :  { %8696 = vmatpush3.bf16.msra.mxu1 %v10335_v46  ;;  %8768 = vmatpush3.bf16.msra.mxu0 %v10319_v20  ;;  %v10461_v37 = vpack.c.bf16 %v10293_v4, %v10285_v63  ;;  %v10485_v50 = vpack.c.bf16 %v10363_v58, %v10346_v29  ;;  %v10493_v57 = vpack.c.bf16 %v10385_v7, %v10380_v6 }
  0x2b   :  { %8697 = vmatprep.subr.bf16.mxu1 %v10066_v0  ;;  %8769 = vmatprep.subr.bf16.mxu0 %v10066_v0  ;;  %v1972_v6 = vmul.f32 %v10776_v40, %v10776_v40 }
  0x2d   :  { %v10788_v10 = vand.u32 4294901760, %v1972_v6 }
  0x2e   :  { %8699 = vmatpush3.bf16.msra.mxu1 %v10358_v34  ;;  %8771 = vmatpush3.bf16.msra.mxu0 %v10341_v28 }
  0x2f   :  { %8700 = vmatprep.subr.bf16.mxu1 %v10066_v0  ;;  %8772 = vmatprep.subr.bf16.mxu0 %v10066_v0 }
  0x32   :  { %8702 = vmatpush3.bf16.msra.mxu1 %v10374_v35  ;;  %8774 = vmatpush3.bf16.msra.mxu0 %v10367_v59 }
  0x33   :  { %8703 = vmatprep.subr.bf16.mxu1 %v10066_v0  ;;  %8775 = vmatprep.subr.bf16.mxu0 %v10066_v0 }
  0x36   :  { %8705 = vmatpush3.bf16.msra.mxu1 %v10394_v41  ;;  %8777 = vmatpush3.bf16.msra.mxu0 %v10389_v9 }
  0x37   :  { %8706 = vmatprep.subr.bf16.mxu1 %v10066_v0  ;;  %8778 = vmatprep.subr.bf16.mxu0 %v10066_v0 }
  0x3a   :  { %8708 = vmatpush3.bf16.msra.mxu1 %v10405_v23  ;;  %8780 = vmatpush3.bf16.msra.mxu0 %v10401_v19 }
  0x3b   :  { %8709 = vmatprep.subr.bf16.mxu1 %v10066_v0  ;;  %8781 = vmatprep.subr.bf16.mxu0 %v10066_v0 }
  0x3e   :  { %8711 = vmatpush3.bf16.msra.mxu1 %v10413_v53  ;;  %8783 = vmatpush3.bf16.msra.mxu0 %v10415_v30 }
  0x3f   :  { %8712 = vmatprep.subr.bf16.mxu1 %v10066_v0  ;;  %8784 = vmatprep.subr.bf16.mxu0 %v10066_v0 }
  0x42   :  { %8714 = vmatpush3.bf16.msra.mxu1 %v10421_v55  ;;  %8786 = vmatpush3.bf16.msra.mxu0 %v10423_v39 }
  0x43   :  { %8715 = vmatprep.subr.bf16.mxu1 %v10066_v0  ;;  %8787 = vmatprep.subr.bf16.mxu0 %v10066_v0 }
  0x45   :  { %6845 = vmatmul.mubr.f32.vlgmr.msra.gmra.mrb[0].mxu1 %v10192_v31  ;;  %6950 = vmatmul.mubr.f32.vlgmr.msra.gmra.mrb[0].mxu0 %v10192_v31 }
  0x46   :  { %8717 = vmatpush3.bf16.msra.mxu1 %v10431_v56  ;;  %8789 = vmatpush3.bf16.msra.mxu0 %v10125_v12 }
  0x47   :  { %8718 = vmatprep.subr.bf16.mxu1 %v10066_v0  ;;  %8790 = vmatprep.subr.bf16.mxu0 %v10066_v0 }
  0x48   :  { %6879 = vmatprep.mubr.msk.f32.mxu1 %vm10067_vm0, %v10068_v8  ;;  %6984 = vmatprep.mubr.msk.f32.mxu0 %vm10067_vm0, %v10068_v8 }
  0x4a   :  { %8720 = vmatpush3.bf16.msra.mxu1 %v10441_v61  ;;  %8792 = vmatpush3.bf16.msra.mxu0 %v10129_v13 }
  0x4b   :  { %8721 = vmatprep.subr.bf16.mxu1 %v10066_v0  ;;  %8793 = vmatprep.subr.bf16.mxu0 %v10066_v0 }
  0x4e   :  { %8723 = vmatpush3.bf16.msra.mxu1 %v10453_v36  ;;  %8795 = vmatpush3.bf16.msra.mxu0 %v10148_v18 }
  0x4f   :  { %8724 = vmatprep.subr.bf16.mxu1 %v10066_v0  ;;  %8796 = vmatprep.subr.bf16.mxu0 %v10066_v0 }
  0x52   :  { %8726 = vmatpush3.bf16.msra.mxu1 %v10461_v37  ;;  %8798 = vmatpush3.bf16.msra.mxu0 %v10175_v25 }
  0x53   :  { %8727 = vmatprep.subr.bf16.mxu1 %v10066_v0  ;;  %8799 = vmatprep.subr.bf16.mxu0 %v10066_v0 }
  0x56   :  { %8729 = vmatpush3.bf16.msra.mxu1 %v10469_v38  ;;  %8801 = vmatpush3.bf16.msra.mxu0 %v10200_v32 }
  0x57   :  { %8730 = vmatprep.subr.bf16.mxu1 %v10066_v0  ;;  %8802 = vmatprep.subr.bf16.mxu0 %v10066_v0 }
  0x5a   :  { %8732 = vmatpush3.bf16.msra.mxu1 %v10477_v43  ;;  %8804 = vmatpush3.bf16.msra.mxu0 %v10239_v44 }
  0x5b   :  { %8733 = vmatprep.subr.bf16.mxu1 %v10066_v0  ;;  %8805 = vmatprep.subr.bf16.mxu0 %v10066_v0 }
  0x5e   :  { %8735 = vmatpush3.bf16.msra.mxu1 %v10485_v50  ;;  %8807 = vmatpush3.bf16.msra.mxu0 %v10258_v51 }
  0x5f   :  { %8736 = vmatprep.subr.bf16.mxu1 %v10066_v0  ;;  %8808 = vmatprep.subr.bf16.mxu0 %v10066_v0 }
  0x62   :  { %8738 = vmatpush3.bf16.msra.mxu1 %v10493_v57  ;;  %8810 = vmatpush3.bf16.msra.mxu0 %v10280_v60 }
  0x63   :  { %8811 = vmatprep.subr.bf16.mxu1 %v10066_v0  ;;  %8955 = vmatprep.subr.bf16.mxu0 %v10066_v0 }
  0x65   :  { %6880 = vmatmul.mubr.f32.vlgmr.msra.gmra.mrb[0].mxu1 %v10229_v42  ;;  %6985 = vmatmul.mubr.f32.vlgmr.msra.gmra.mrb[0].mxu0 %v10192_v31  ;;  %v10516_v31 = vld [vmem:[%s11561_s1] sm:$0xff] }
  0x66   :  { %8813 = vmatpush3.bf16.msra.mxu1 %v10125_v12  ;;  %8957 = vmatpush3.bf16.msra.mxu0 %v10125_v12  ;;  %v10521_v42 = vld [vmem:[%s11562_s2] sm:$0xff]  ;;  %v684_v63 = vmul.f32 %v10516_v31, %v10516_v31  ;;  %v2616_v7 = vmul.f32 %v10516_v31, %v10155_v21  ;;  %v10797_v21 = vsub.f32 %v1972_v6, %v10788_v10 }
  0x67   :  { %8814 = vmatprep.subr.bf16.mxu1 %v10066_v0  ;;  %8958 = vmatprep.subr.bf16.mxu0 %v10066_v0  ;;  %v1328_v4 = vmul.f32 %v10521_v42, %v10521_v42 }
  0x68   :  { %7019 = vmatprep.mubr.msk.f32.mxu1 %vm10067_vm0, %v10068_v8  ;;  %7229 = vmatprep.mubr.msk.f32.mxu0 %vm10067_vm0, %v10068_v8  ;;  %v10533_v11 = vand.u32 4294901760, %v684_v63  ;;  %v10790_v16 = vand.u32 4294901760, %v2616_v7  ;;  %v2056_v47 = vand.u32 4294901760, %v10797_v21 }
  0x69   :  { %v10535_v14 = vand.u32 4294901760, %v1328_v4 }
  0x6a   :  { %8816 = vmatpush3.bf16.msra.mxu1 %v10129_v13  ;;  %8960 = vmatpush3.bf16.msra.mxu0 %v10129_v13  ;;  %v10542_v26 = vsub.f32 %v684_v63, %v10533_v11  ;;  %v10800_v17 = vsub.f32 %v2616_v7, %v10790_v16  ;;  %v2057_v33 = vsub.f32 %v10797_v21, %v2056_v47 }
  0x6b   :  { %8817 = vmatprep.subr.bf16.mxu1 %v10066_v0  ;;  %8961 = vmatprep.subr.bf16.mxu0 %v10066_v0  ;;  %v10545_v27 = vsub.f32 %v1328_v4, %v10535_v14  ;;  %v3262_v4 = vmul.f32 %v10776_v40, %v10521_v42 }
  0x6c   :  { %v768_v29 = vand.u32 4294901760, %v10542_v26  ;;  %v2700_v49 = vand.u32 4294901760, %v10800_v17  ;;  %v2058_v31 = vand.u32 4294901760, %v2057_v33 }
  0x6d   :  { %v1412_v58 = vand.u32 4294901760, %v10545_v27 }
  0x6e   :  { %8819 = vmatpush3.bf16.msra.mxu1 %v10148_v18  ;;  %8963 = vmatpush3.bf16.msra.mxu0 %v10148_v18  ;;  %v769_v62 = vsub.f32 %v10542_v26, %v768_v29  ;;  %v2701_v54 = vsub.f32 %v10800_v17, %v2700_v49 }
  0x6f   :  { %8820 = vmatprep.subr.bf16.mxu1 %v10066_v0  ;;  %8964 = vmatprep.subr.bf16.mxu0 %v10066_v0  ;;  %v1413_v1 = vsub.f32 %v10545_v27, %v1412_v58 }
  0x70   :  { %v770_v2 = vand.u32 4294901760, %v769_v62  ;;  %v2702_v63 = vand.u32 4294901760, %v2701_v54 }
  0x71   :  { %v1414_v3 = vand.u32 4294901760, %v1413_v1 }
  0x72   :  { %8822 = vmatpush3.bf16.msra.mxu1 %v10175_v25  ;;  %8966 = vmatpush3.bf16.msra.mxu0 %v10175_v25 }
  0x73   :  { %8823 = vmatprep.subr.bf16.mxu1 %v10066_v0  ;;  %8967 = vmatprep.subr.bf16.mxu0 %v10066_v0 }
  0x76   :  { %8825 = vmatpush3.bf16.msra.mxu1 %v10200_v32  ;;  %8969 = vmatpush3.bf16.msra.mxu0 %v10200_v32 }
  0x77   :  { %8826 = vmatprep.subr.bf16.mxu1 %v10066_v0  ;;  %8970 = vmatprep.subr.bf16.mxu0 %v10066_v0 }
  0x7a   :  { %8828 = vmatpush3.bf16.msra.mxu1 %v10239_v44  ;;  %8972 = vmatpush3.bf16.msra.mxu0 %v10239_v44 }
  0x7b   :  { %8829 = vmatprep.subr.bf16.mxu1 %v10066_v0  ;;  %8973 = vmatprep.subr.bf16.mxu0 %v10066_v0 }
  0x7e   :  { %8831 = vmatpush3.bf16.msra.mxu1 %v10258_v51  ;;  %8975 = vmatpush3.bf16.msra.mxu0 %v10258_v51 }
  0x7f   :  { %8832 = vmatprep.subr.bf16.mxu1 %v10066_v0  ;;  %8976 = vmatprep.subr.bf16.mxu0 %v10066_v0 }
  0x82   :  { %8834 = vmatpush3.bf16.msra.mxu1 %v10280_v60  ;;  %8978 = vmatpush3.bf16.msra.mxu0 %v10280_v60 }
  0x83   :  { %8835 = vmatprep.subr.bf16.mxu1 %v10066_v0  ;;  %8979 = vmatprep.subr.bf16.mxu0 %v10066_v0 }
  0x85   :  { %7020 = vmatmul.mubr.f32.vlgmr.msra.gmra.mrb[2].mxu1 %v770_v2  ;;  %7230 = vmatmul.mubr.f32.vlgmr.msra.gmra.mrb[2].mxu0 %v1414_v3 }
  0x86   :  { %8837 = vmatpush3.bf16.msra.mxu1 %v10312_v15  ;;  %8981 = vmatpush3.bf16.msra.mxu0 %v10312_v15 }
  0x87   :  { %8838 = vmatprep.subr.bf16.mxu1 %v10066_v0  ;;  %8982 = vmatprep.subr.bf16.mxu0 %v10066_v0 }
  0x88   :  { %7054 = vmatprep.mubr.msk.f32.mxu1 %vm10067_vm0, %v10068_v8  ;;  %7264 = vmatprep.mubr.msk.f32.mxu0 %vm10067_vm0, %v10068_v8 }
  0x8a   :  { %8840 = vmatpush3.bf16.msra.mxu1 %v10335_v46  ;;  %8984 = vmatpush3.bf16.msra.mxu0 %v10335_v46 }
  0x8b   :  { %8841 = vmatprep.subr.bf16.mxu1 %v10066_v0  ;;  %8985 = vmatprep.subr.bf16.mxu0 %v10066_v0 }
  0x8e   :  { %8843 = vmatpush3.bf16.msra.mxu1 %v10358_v34  ;;  %8987 = vmatpush3.bf16.msra.mxu0 %v10358_v34 }
  0x8f   :  { %8844 = vmatprep.subr.bf16.mxu1 %v10066_v0  ;;  %8988 = vmatprep.subr.bf16.mxu0 %v10066_v0 }
  0x92   :  { %8846 = vmatpush3.bf16.msra.mxu1 %v10374_v35  ;;  %8990 = vmatpush3.bf16.msra.mxu0 %v10374_v35 }
  0x93   :  { %8847 = vmatprep.subr.bf16.mxu1 %v10066_v0  ;;  %8991 = vmatprep.subr.bf16.mxu0 %v10066_v0 }
  0x96   :  { %8849 = vmatpush3.bf16.msra.mxu1 %v10394_v41  ;;  %8993 = vmatpush3.bf16.msra.mxu0 %v10394_v41 }
  0x97   :  { %8850 = vmatprep.subr.bf16.mxu1 %v10066_v0  ;;  %8994 = vmatprep.subr.bf16.mxu0 %v10066_v0 }
  0x9a   :  { %8852 = vmatpush3.bf16.msra.mxu1 %v10405_v23  ;;  %8996 = vmatpush3.bf16.msra.mxu0 %v10405_v23 }
  0x9b   :  { %8853 = vmatprep.subr.bf16.mxu1 %v10066_v0  ;;  %8997 = vmatprep.subr.bf16.mxu0 %v10066_v0 }
  0x9e   :  { %8855 = vmatpush3.bf16.msra.mxu1 %v10413_v53  ;;  %8999 = vmatpush3.bf16.msra.mxu0 %v10413_v53 }
  0x9f   :  { %8856 = vmatprep.subr.bf16.mxu1 %v10066_v0  ;;  %9000 = vmatprep.subr.bf16.mxu0 %v10066_v0 }
  0xa2   :  { %8858 = vmatpush3.bf16.msra.mxu1 %v10421_v55  ;;  %9002 = vmatpush3.bf16.msra.mxu0 %v10421_v55 }
  0xa3   :  { %8859 = vmatprep.subr.bf16.mxu1 %v10066_v0  ;;  %9003 = vmatprep.subr.bf16.mxu0 %v10066_v0 }
  0xa5   :  { %7055 = vmatmul.mubr.f32.vlgmr.msra.gmra.mrb[2].mxu1 %v10533_v11  ;;  %7265 = vmatmul.mubr.f32.vlgmr.msra.gmra.mrb[2].mxu0 %v10535_v14 }
  0xa6   :  { %8861 = vmatpush3.bf16.msra.mxu1 %v10431_v56  ;;  %9005 = vmatpush3.bf16.msra.mxu0 %v10431_v56 }
  0xa7   :  { %8862 = vmatprep.subr.bf16.mxu1 %v10066_v0  ;;  %9006 = vmatprep.subr.bf16.mxu0 %v10066_v0 }
  0xa8   :  { %7089 = vmatprep.mubr.msk.f32.mxu1 %vm10067_vm0, %v10068_v8  ;;  %7299 = vmatprep.mubr.msk.f32.mxu0 %vm10067_vm0, %v10068_v8 }
  0xaa   :  { %8864 = vmatpush3.bf16.msra.mxu1 %v10441_v61  ;;  %9008 = vmatpush3.bf16.msra.mxu0 %v10441_v61 }
  0xab   :  { %8865 = vmatprep.subr.bf16.mxu1 %v10066_v0  ;;  %9009 = vmatprep.subr.bf16.mxu0 %v10066_v0 }
  0xae   :  { %8867 = vmatpush3.bf16.msra.mxu1 %v10453_v36  ;;  %9011 = vmatpush3.bf16.msra.mxu0 %v10453_v36 }
  0xaf   :  { %8868 = vmatprep.subr.bf16.mxu1 %v10066_v0  ;;  %9012 = vmatprep.subr.bf16.mxu0 %v10066_v0 }
  0xb2   :  { %8870 = vmatpush3.bf16.msra.mxu1 %v10461_v37  ;;  %9014 = vmatpush3.bf16.msra.mxu0 %v10461_v37 }
  0xb3   :  { %8871 = vmatprep.subr.bf16.mxu1 %v10066_v0  ;;  %9015 = vmatprep.subr.bf16.mxu0 %v10066_v0 }
  0xb6   :  { %8873 = vmatpush3.bf16.msra.mxu1 %v10469_v38  ;;  %9017 = vmatpush3.bf16.msra.mxu0 %v10469_v38 }
  0xb7   :  { %8874 = vmatprep.subr.bf16.mxu1 %v10066_v0  ;;  %9018 = vmatprep.subr.bf16.mxu0 %v10066_v0 }
  0xba   :  { %8876 = vmatpush3.bf16.msra.mxu1 %v10477_v43  ;;  %9020 = vmatpush3.bf16.msra.mxu0 %v10477_v43 }
  0xbb   :  { %8877 = vmatprep.subr.bf16.mxu1 %v10066_v0  ;;  %9021 = vmatprep.subr.bf16.mxu0 %v10066_v0 }
  0xbe   :  { %8879 = vmatpush3.bf16.msra.mxu1 %v10485_v50  ;;  %9023 = vmatpush3.bf16.msra.mxu0 %v10485_v50 }
  0xbf   :  { %8880 = vmatprep.subr.bf16.mxu1 %v10066_v0  ;;  %9024 = vmatprep.subr.bf16.mxu0 %v10066_v0 }
  0xc2   :  { %8882 = vmatpush3.bf16.msra.mxu1 %v10493_v57  ;;  %9026 = vmatpush3.bf16.msra.mxu0 %v10493_v57 }
  0xc3   :  { %8883 = vmatprep.subr.bf16.mxu1 %v10066_v0  ;;  %9027 = vmatprep.subr.bf16.mxu0 %v10066_v0 }
  0xc5   :  { %7090 = vmatmul.mubr.f32.vlgmr.msra.gmra.mrb[2].mxu1 %v10542_v26  ;;  %7300 = vmatmul.mubr.f32.vlgmr.msra.gmra.mrb[2].mxu0 %v10545_v27  ;;  %v11045_v26 = vand.u32 4294901760, %v3262_v4 }
  0xc6   :  { %8885 = vmatpush3.bf16.msra.mxu1 %v10125_v12  ;;  %9029 = vmatpush3.bf16.msra.mxu0 %v10125_v12 }
  0xc7   :  { %8886 = vmatprep.subr.bf16.mxu1 %v10066_v0  ;;  %9030 = vmatprep.subr.bf16.mxu0 %v10066_v0 }
  0xc8   :  { %7124 = vmatprep.mubr.msk.f32.mxu1 %vm10067_vm0, %v10068_v8  ;;  %7334 = vmatprep.mubr.msk.f32.mxu0 %vm10067_vm0, %v10068_v8 }
  0xca   :  { %8888 = vmatpush3.bf16.msra.mxu1 %v10129_v13  ;;  %9032 = vmatpush3.bf16.msra.mxu0 %v10129_v13 }
  0xcb   :  { %8889 = vmatprep.subr.bf16.mxu1 %v10066_v0  ;;  %9033 = vmatprep.subr.bf16.mxu0 %v10066_v0 }
  0xce   :  { %8891 = vmatpush3.bf16.msra.mxu1 %v10148_v18  ;;  %9035 = vmatpush3.bf16.msra.mxu0 %v10148_v18 }
  0xcf   :  { %8892 = vmatprep.subr.bf16.mxu1 %v10066_v0  ;;  %9036 = vmatprep.subr.bf16.mxu0 %v10066_v0 }
  0xd2   :  { %8894 = vmatpush3.bf16.msra.mxu1 %v10175_v25  ;;  %9038 = vmatpush3.bf16.msra.mxu0 %v10175_v25 }
  0xd3   :  { %8895 = vmatprep.subr.bf16.mxu1 %v10066_v0  ;;  %9039 = vmatprep.subr.bf16.mxu0 %v10066_v0 }
  0xd6   :  { %8897 = vmatpush3.bf16.msra.mxu1 %v10200_v32  ;;  %9041 = vmatpush3.bf16.msra.mxu0 %v10200_v32 }
  0xd7   :  { %8898 = vmatprep.subr.bf16.mxu1 %v10066_v0  ;;  %9042 = vmatprep.subr.bf16.mxu0 %v10066_v0 }
  0xda   :  { %8900 = vmatpush3.bf16.msra.mxu1 %v10239_v44  ;;  %9044 = vmatpush3.bf16.msra.mxu0 %v10239_v44 }
  0xdb   :  { %8901 = vmatprep.subr.bf16.mxu1 %v10066_v0  ;;  %9045 = vmatprep.subr.bf16.mxu0 %v10066_v0 }
  0xde   :  { %8903 = vmatpush3.bf16.msra.mxu1 %v10258_v51  ;;  %9047 = vmatpush3.bf16.msra.mxu0 %v10258_v51 }
  0xdf   :  { %8904 = vmatprep.subr.bf16.mxu1 %v10066_v0  ;;  %9048 = vmatprep.subr.bf16.mxu0 %v10066_v0 }
  0xe2   :  { %8906 = vmatpush3.bf16.msra.mxu1 %v10280_v60  ;;  %9050 = vmatpush3.bf16.msra.mxu0 %v10280_v60 }
  0xe3   :  { %8907 = vmatprep.subr.bf16.mxu1 %v10066_v0  ;;  %9051 = vmatprep.subr.bf16.mxu0 %v10066_v0 }
  0xe5   :  { %7125 = vmatmul.mubr.f32.vlgmr.msra.gmra.mrb[2].mxu1 %v768_v29  ;;  %7335 = vmatmul.mubr.f32.vlgmr.msra.gmra.mrb[2].mxu0 %v1412_v58 }
  0xe6   :  { %8909 = vmatpush3.bf16.msra.mxu1 %v10297_v5  ;;  %9053 = vmatpush3.bf16.msra.mxu0 %v10297_v5 }
  0xe7   :  { %8910 = vmatprep.subr.bf16.mxu1 %v10066_v0  ;;  %9054 = vmatprep.subr.bf16.mxu0 %v10066_v0 }
  0xe8   :  { %7159 = vmatprep.mubr.msk.f32.mxu1 %vm10067_vm0, %v10068_v8  ;;  %7369 = vmatprep.mubr.msk.f32.mxu0 %vm10067_vm0, %v10068_v8 }
  0xea   :  { %8912 = vmatpush3.bf16.msra.mxu1 %v10319_v20  ;;  %9056 = vmatpush3.bf16.msra.mxu0 %v10319_v20 }
  0xeb   :  { %8913 = vmatprep.subr.bf16.mxu1 %v10066_v0  ;;  %9057 = vmatprep.subr.bf16.mxu0 %v10066_v0 }
  0xee   :  { %8915 = vmatpush3.bf16.msra.mxu1 %v10341_v28  ;;  %9059 = vmatpush3.bf16.msra.mxu0 %v10341_v28 }
  0xef   :  { %8916 = vmatprep.subr.bf16.mxu1 %v10066_v0  ;;  %9060 = vmatprep.subr.bf16.mxu0 %v10066_v0 }
  0xf2   :  { %8918 = vmatpush3.bf16.msra.mxu1 %v10367_v59  ;;  %9062 = vmatpush3.bf16.msra.mxu0 %v10367_v59 }
  0xf3   :  { %8919 = vmatprep.subr.bf16.mxu1 %v10066_v0  ;;  %9063 = vmatprep.subr.bf16.mxu0 %v10066_v0 }
  0xf6   :  { %8921 = vmatpush3.bf16.msra.mxu1 %v10389_v9  ;;  %9065 = vmatpush3.bf16.msra.mxu0 %v10389_v9 }
  0xf7   :  { %8922 = vmatprep.subr.bf16.mxu1 %v10066_v0  ;;  %9066 = vmatprep.subr.bf16.mxu0 %v10066_v0 }
  0xfa   :  { %8924 = vmatpush3.bf16.msra.mxu1 %v10401_v19  ;;  %9068 = vmatpush3.bf16.msra.mxu0 %v10401_v19 }
  0xfb   :  { %8925 = vmatprep.subr.bf16.mxu1 %v10066_v0  ;;  %9069 = vmatprep.subr.bf16.mxu0 %v10066_v0 }
  0xfe   :  { %8927 = vmatpush3.bf16.msra.mxu1 %v10415_v30  ;;  %9071 = vmatpush3.bf16.msra.mxu0 %v10415_v30 }
  0xff   :  { %8928 = vmatprep.subr.bf16.mxu1 %v10066_v0  ;;  %9072 = vmatprep.subr.bf16.mxu0 %v10066_v0 }
 0x102   :  { %8930 = vmatpush3.bf16.msra.mxu1 %v10423_v39  ;;  %9074 = vmatpush3.bf16.msra.mxu0 %v10423_v39 }
 0x103   :  { %8931 = vmatprep.subr.bf16.mxu1 %v10066_v0  ;;  %9075 = vmatprep.subr.bf16.mxu0 %v10066_v0 }
 0x105   :  { %7160 = vmatmul.mubr.f32.vlgmr.msra.gmra.mrb[2].mxu1 %v10533_v11  ;;  %7370 = vmatmul.mubr.f32.vlgmr.msra.gmra.mrb[2].mxu0 %v10535_v14 }
 0x106   :  { %8933 = vmatpush3.bf16.msra.mxu1 %v10125_v12  ;;  %9077 = vmatpush3.bf16.msra.mxu0 %v10125_v12 }
 0x107   :  { %8934 = vmatprep.subr.bf16.mxu1 %v10066_v0  ;;  %9078 = vmatprep.subr.bf16.mxu0 %v10066_v0 }
 0x108   :  { %7194 = vmatprep.mubr.msk.f32.mxu1 %vm10067_vm0, %v10068_v8  ;;  %7404 = vmatprep.mubr.msk.f32.mxu0 %vm10067_vm0, %v10068_v8 }
 0x10a   :  { %8936 = vmatpush3.bf16.msra.mxu1 %v10129_v13  ;;  %9080 = vmatpush3.bf16.msra.mxu0 %v10129_v13 }
 0x10b   :  { %8937 = vmatprep.subr.bf16.mxu1 %v10066_v0  ;;  %9081 = vmatprep.subr.bf16.mxu0 %v10066_v0 }
 0x10e   :  { %8939 = vmatpush3.bf16.msra.mxu1 %v10148_v18  ;;  %9083 = vmatpush3.bf16.msra.mxu0 %v10148_v18 }
 0x10f   :  { %8940 = vmatprep.subr.bf16.mxu1 %v10066_v0  ;;  %9084 = vmatprep.subr.bf16.mxu0 %v10066_v0 }
 0x112   :  { %8942 = vmatpush3.bf16.msra.mxu1 %v10175_v25  ;;  %9086 = vmatpush3.bf16.msra.mxu0 %v10175_v25 }
 0x113   :  { %8943 = vmatprep.subr.bf16.mxu1 %v10066_v0  ;;  %9087 = vmatprep.subr.bf16.mxu0 %v10066_v0 }
 0x116   :  { %8945 = vmatpush3.bf16.msra.mxu1 %v10200_v32  ;;  %9089 = vmatpush3.bf16.msra.mxu0 %v10200_v32 }
 0x117   :  { %8946 = vmatprep.subr.bf16.mxu1 %v10066_v0  ;;  %9090 = vmatprep.subr.bf16.mxu0 %v10066_v0 }
 0x11a   :  { %8948 = vmatpush3.bf16.msra.mxu1 %v10239_v44  ;;  %9092 = vmatpush3.bf16.msra.mxu0 %v10239_v44 }
 0x11b   :  { %8949 = vmatprep.subr.bf16.mxu1 %v10066_v0  ;;  %9093 = vmatprep.subr.bf16.mxu0 %v10066_v0 }
 0x11e   :  { %8951 = vmatpush3.bf16.msra.mxu1 %v10258_v51  ;;  %9095 = vmatpush3.bf16.msra.mxu0 %v10258_v51 }
 0x11f   :  { %8952 = vmatprep.subr.bf16.mxu1 %v10066_v0  ;;  %9096 = vmatprep.subr.bf16.mxu0 %v10066_v0 }
 0x122   :  { %8954 = vmatpush3.bf16.msra.mxu1 %v10280_v60  ;;  %9098 = vmatpush3.bf16.msra.mxu0 %v10280_v60 }
 0x123   :  { %9099 = vmatprep.subr.bf16.mxu1 %v10066_v0  ;;  %9243 = vmatprep.subr.bf16.mxu0 %v10066_v0 }
 0x125   :  { %7195 = vmatmul.mubr.f32.vlgmr.msra.gmra.mrb[2].mxu1 %v10533_v11  ;;  %7405 = vmatmul.mubr.f32.vlgmr.msra.gmra.mrb[2].mxu0 %v10535_v14  ;;  %v11037_v11 = vld [vmem:[%s11560_s0] sm:$0xff] }
 0x126   :  { %9101 = vmatpush3.bf16.msra.mxu1 %v10125_v12  ;;  %9245 = vmatpush3.bf16.msra.mxu0 %v10125_v12  ;;  %v3908_v14 = vmul.f32 %v11037_v11, %v10521_v42  ;;  %v11054_v42 = vsub.f32 %v3262_v4, %v11045_v26  ;;  %v4554_v54 = vmul.f32 %v11037_v11, %v10776_v40 }
 0x127   :  { %9102 = vmatprep.subr.bf16.mxu1 %v10066_v0  ;;  %9246 = vmatprep.subr.bf16.mxu0 %v10066_v0 }
 0x128   :  { %7439 = vmatprep.mubr.msk.f32.mxu1 %vm10067_vm0, %v10068_v8  ;;  %7649 = vmatprep.mubr.msk.f32.mxu0 %vm10067_vm0, %v10068_v8  ;;  %v11047_v27 = vand.u32 4294901760, %v3908_v14  ;;  %v3346_v2 = vand.u32 4294901760, %v11054_v42 }
 0x12a   :  { %9104 = vmatpush3.bf16.msra.mxu1 %v10129_v13  ;;  %9248 = vmatpush3.bf16.msra.mxu0 %v10129_v13  ;;  %v11057_v29 = vsub.f32 %v3908_v14, %v11047_v27  ;;  %v11314_v14 = vand.u32 4294901760, %v4554_v54 }
 0x12b   :  { %9105 = vmatprep.subr.bf16.mxu1 %v10066_v0  ;;  %9249 = vmatprep.subr.bf16.mxu0 %v10066_v0 }
 0x12c   :  { %v3992_v3 = vand.u32 4294901760, %v11057_v29  ;;  %v11323_v11 = vsub.f32 %v4554_v54, %v11314_v14 }
 0x12e   :  { %9107 = vmatpush3.bf16.msra.mxu1 %v10148_v18  ;;  %9251 = vmatpush3.bf16.msra.mxu0 %v10148_v18 }
 0x12f   :  { %9108 = vmatprep.subr.bf16.mxu1 %v10066_v0  ;;  %9252 = vmatprep.subr.bf16.mxu0 %v10066_v0 }
 0x132   :  { %9110 = vmatpush3.bf16.msra.mxu1 %v10175_v25  ;;  %9254 = vmatpush3.bf16.msra.mxu0 %v10175_v25 }
 0x133   :  { %9111 = vmatprep.subr.bf16.mxu1 %v10066_v0  ;;  %9255 = vmatprep.subr.bf16.mxu0 %v10066_v0 }
 0x136   :  { %9113 = vmatpush3.bf16.msra.mxu1 %v10200_v32  ;;  %9257 = vmatpush3.bf16.msra.mxu0 %v10200_v32 }
 0x137   :  { %9114 = vmatprep.subr.bf16.mxu1 %v10066_v0  ;;  %9258 = vmatprep.subr.bf16.mxu0 %v10066_v0 }
 0x138   :  { %v383_v48 = vpop.f32.mrb[0].mxu1  ;;  %v678_v45 = vpop.f32.mrb[0].mxu0 }
 0x139   :  { %v10806_v52 = vadd.f32 %v678_v45, %v383_v48  ;;  %v6881_v22 = vpop.f32.mrb[1].mxu1  ;;  %v6986_v24 = vpop.f32.mrb[1].mxu0 }
 0x13a   :  { %9116 = vmatpush3.bf16.msra.mxu1 %v10239_v44  ;;  %9260 = vmatpush3.bf16.msra.mxu0 %v10239_v44 }
 0x13b   :  { %9117 = vmatprep.subr.bf16.mxu1 %v10066_v0  ;;  %9261 = vmatprep.subr.bf16.mxu0 %v10066_v0  ;;  %v682_v58 = vmax.f32 %v10806_v52, 1e-16 }
 0x13d   :  { %10055 = vrsqrt.f32 %v682_v58 }
 0x13e   :  { %9119 = vmatpush3.bf16.msra.mxu1 %v10258_v51  ;;  %9263 = vmatpush3.bf16.msra.mxu0 %v10258_v51 }
 0x13f   :  { %9120 = vmatprep.subr.bf16.mxu1 %v10066_v0  ;;  %9264 = vmatprep.subr.bf16.mxu0 %v10066_v0 }
 0x142   :  { %9122 = vmatpush3.bf16.msra.mxu1 %v10280_v60  ;;  %9266 = vmatpush3.bf16.msra.mxu0 %v10280_v60 }
 0x143   :  { %9123 = vmatprep.subr.bf16.mxu1 %v10066_v0  ;;  %9267 = vmatprep.subr.bf16.mxu0 %v10066_v0 }
 0x145   :  { %7440 = vmatmul.mubr.f32.vlgmr.msra.gmra.mrb[4].mxu1 %v2058_v31  ;;  %7650 = vmatmul.mubr.f32.vlgmr.msra.gmra.mrb[4].mxu0 %v2702_v63  ;;  %v10064_v31 = vld [vmem:[%s11561_s1] sm:$0xff] }
 0x146   :  { %9125 = vmatpush3.bf16.msra.mxu1 %v10312_v15  ;;  %9269 = vmatpush3.bf16.msra.mxu0 %v10312_v15  ;;  %v10065_v63 = vld [vmem:[%s11562_s2] sm:$0xff] }
 0x147   :  { %9126 = vmatprep.subr.bf16.mxu1 %v10066_v0  ;;  %9270 = vmatprep.subr.bf16.mxu0 %v10066_v0  ;;  %v11084_v52 = vpop.eup %10055  ;;  %v5200_v4 = vmul.f32 %v10065_v63, %v10064_v31 }
 0x148   :  { %7474 = vmatprep.mubr.msk.f32.mxu1 %vm10067_vm0, %v10068_v8  ;;  %7684 = vmatprep.mubr.msk.f32.mxu0 %vm10067_vm0, %v10068_v8 }
 0x149   :  { %v11316_v40 = vand.u32 4294901760, %v5200_v4 }
 0x14a   :  { %9128 = vmatpush3.bf16.msra.mxu1 %v10335_v46  ;;  %9272 = vmatpush3.bf16.msra.mxu0 %v10335_v46 }
 0x14b   :  { %9129 = vmatprep.subr.bf16.mxu1 %v10066_v0  ;;  %9273 = vmatprep.subr.bf16.mxu0 %v10066_v0 }
 0x14e   :  { %9131 = vmatpush3.bf16.msra.mxu1 %v10358_v34  ;;  %9275 = vmatpush3.bf16.msra.mxu0 %v10358_v34 }
 0x14f   :  { %9132 = vmatprep.subr.bf16.mxu1 %v10066_v0  ;;  %9276 = vmatprep.subr.bf16.mxu0 %v10066_v0 }
 0x152   :  { %9134 = vmatpush3.bf16.msra.mxu1 %v10374_v35  ;;  %9278 = vmatpush3.bf16.msra.mxu0 %v10374_v35 }
 0x153   :  { %9135 = vmatprep.subr.bf16.mxu1 %v10066_v0  ;;  %9279 = vmatprep.subr.bf16.mxu0 %v10066_v0 }
 0x156   :  { %9137 = vmatpush3.bf16.msra.mxu1 %v10394_v41  ;;  %9281 = vmatpush3.bf16.msra.mxu0 %v10394_v41 }
 0x157   :  { %9138 = vmatprep.subr.bf16.mxu1 %v10066_v0  ;;  %9282 = vmatprep.subr.bf16.mxu0 %v10066_v0 }
 0x15a   :  { %9140 = vmatpush3.bf16.msra.mxu1 %v10405_v23  ;;  %9284 = vmatpush3.bf16.msra.mxu0 %v10405_v23 }
 0x15b   :  { %9141 = vmatprep.subr.bf16.mxu1 %v10066_v0  ;;  %9285 = vmatprep.subr.bf16.mxu0 %v10066_v0 }
 0x15e   :  { %9143 = vmatpush3.bf16.msra.mxu1 %v10413_v53  ;;  %9287 = vmatpush3.bf16.msra.mxu0 %v10413_v53 }
 0x15f   :  { %9144 = vmatprep.subr.bf16.mxu1 %v10066_v0  ;;  %9288 = vmatprep.subr.bf16.mxu0 %v10066_v0 }
 0x162   :  { %9146 = vmatpush3.bf16.msra.mxu1 %v10421_v55  ;;  %9290 = vmatpush3.bf16.msra.mxu0 %v10421_v55 }
 0x163   :  { %9147 = vmatprep.subr.bf16.mxu1 %v10066_v0  ;;  %9291 = vmatprep.subr.bf16.mxu0 %v10066_v0 }
 0x165   :  { %7475 = vmatmul.mubr.f32.vlgmr.msra.gmra.mrb[4].mxu1 %v10788_v10  ;;  %7685 = vmatmul.mubr.f32.vlgmr.msra.gmra.mrb[4].mxu0 %v10790_v16 }
 0x166   :  { %9149 = vmatpush3.bf16.msra.mxu1 %v10431_v56  ;;  %9293 = vmatpush3.bf16.msra.mxu0 %v10431_v56 }
 0x167   :  { %9150 = vmatprep.subr.bf16.mxu1 %v10066_v0  ;;  %9294 = vmatprep.subr.bf16.mxu0 %v10066_v0 }
 0x168   :  { %7509 = vmatprep.mubr.msk.f32.mxu1 %vm10067_vm0, %v10068_v8  ;;  %7719 = vmatprep.mubr.msk.f32.mxu0 %vm10067_vm0, %v10068_v8 }
 0x16a   :  { %9152 = vmatpush3.bf16.msra.mxu1 %v10441_v61  ;;  %9296 = vmatpush3.bf16.msra.mxu0 %v10441_v61 }
 0x16b   :  { %9153 = vmatprep.subr.bf16.mxu1 %v10066_v0  ;;  %9297 = vmatprep.subr.bf16.mxu0 %v10066_v0 }
 0x16e   :  { %9155 = vmatpush3.bf16.msra.mxu1 %v10453_v36  ;;  %9299 = vmatpush3.bf16.msra.mxu0 %v10453_v36 }
 0x16f   :  { %9156 = vmatprep.subr.bf16.mxu1 %v10066_v0  ;;  %9300 = vmatprep.subr.bf16.mxu0 %v10066_v0 }
 0x172   :  { %9158 = vmatpush3.bf16.msra.mxu1 %v10461_v37  ;;  %9302 = vmatpush3.bf16.msra.mxu0 %v10461_v37 }
 0x173   :  { %9159 = vmatprep.subr.bf16.mxu1 %v10066_v0  ;;  %9303 = vmatprep.subr.bf16.mxu0 %v10066_v0 }
 0x176   :  { %9161 = vmatpush3.bf16.msra.mxu1 %v10469_v38  ;;  %9305 = vmatpush3.bf16.msra.mxu0 %v10469_v38 }
 0x177   :  { %9162 = vmatprep.subr.bf16.mxu1 %v10066_v0  ;;  %9306 = vmatprep.subr.bf16.mxu0 %v10066_v0 }
 0x17a   :  { %9164 = vmatpush3.bf16.msra.mxu1 %v10477_v43  ;;  %9308 = vmatpush3.bf16.msra.mxu0 %v10477_v43 }
 0x17b   :  { %9165 = vmatprep.subr.bf16.mxu1 %v10066_v0  ;;  %9309 = vmatprep.subr.bf16.mxu0 %v10066_v0 }
 0x17e   :  { %9167 = vmatpush3.bf16.msra.mxu1 %v10485_v50  ;;  %9311 = vmatpush3.bf16.msra.mxu0 %v10485_v50 }
 0x17f   :  { %9168 = vmatprep.subr.bf16.mxu1 %v10066_v0  ;;  %9312 = vmatprep.subr.bf16.mxu0 %v10066_v0 }
 0x182   :  { %9170 = vmatpush3.bf16.msra.mxu1 %v10493_v57  ;;  %9314 = vmatpush3.bf16.msra.mxu0 %v10493_v57 }
 0x183   :  { %9171 = vmatprep.subr.bf16.mxu1 %v10066_v0  ;;  %9315 = vmatprep.subr.bf16.mxu0 %v10066_v0 }
 0x185   :  { %7510 = vmatmul.mubr.f32.vlgmr.msra.gmra.mrb[4].mxu1 %v10797_v21  ;;  %7720 = vmatmul.mubr.f32.vlgmr.msra.gmra.mrb[4].mxu0 %v10800_v17  ;;  %v3347_v21 = vsub.f32 %v11054_v42, %v3346_v2  ;;  %v3993_v17 = vsub.f32 %v11057_v29, %v3992_v3 }
 0x186   :  { %9173 = vmatpush3.bf16.msra.mxu1 %v10125_v12  ;;  %9317 = vmatpush3.bf16.msra.mxu0 %v10125_v12 }
 0x187   :  { %9174 = vmatprep.subr.bf16.mxu1 %v10066_v0  ;;  %9318 = vmatprep.subr.bf16.mxu0 %v10066_v0  ;;  %v3348_v48 = vand.u32 4294901760, %v3347_v21  ;;  %v3994_v45 = vand.u32 4294901760, %v3993_v17 }
 0x188   :  { %7544 = vmatprep.mubr.msk.f32.mxu1 %vm10067_vm0, %v10068_v8  ;;  %7754 = vmatprep.mubr.msk.f32.mxu0 %vm10067_vm0, %v10068_v8 }
 0x18a   :  { %9176 = vmatpush3.bf16.msra.mxu1 %v10129_v13  ;;  %9320 = vmatpush3.bf16.msra.mxu0 %v10129_v13 }
 0x18b   :  { %9177 = vmatprep.subr.bf16.mxu1 %v10066_v0  ;;  %9321 = vmatprep.subr.bf16.mxu0 %v10066_v0 }
 0x18e   :  { %9179 = vmatpush3.bf16.msra.mxu1 %v10148_v18  ;;  %9323 = vmatpush3.bf16.msra.mxu0 %v10148_v18 }
 0x18f   :  { %9180 = vmatprep.subr.bf16.mxu1 %v10066_v0  ;;  %9324 = vmatprep.subr.bf16.mxu0 %v10066_v0 }
 0x192   :  { %9182 = vmatpush3.bf16.msra.mxu1 %v10175_v25  ;;  %9326 = vmatpush3.bf16.msra.mxu0 %v10175_v25 }
 0x193   :  { %9183 = vmatprep.subr.bf16.mxu1 %v10066_v0  ;;  %9327 = vmatprep.subr.bf16.mxu0 %v10066_v0 }
 0x196   :  { %9185 = vmatpush3.bf16.msra.mxu1 %v10200_v32  ;;  %9329 = vmatpush3.bf16.msra.mxu0 %v10200_v32 }
 0x197   :  { %9186 = vmatprep.subr.bf16.mxu1 %v10066_v0  ;;  %9330 = vmatprep.subr.bf16.mxu0 %v10066_v0 }
 0x19a   :  { %9188 = vmatpush3.bf16.msra.mxu1 %v10239_v44  ;;  %9332 = vmatpush3.bf16.msra.mxu0 %v10239_v44 }
 0x19b   :  { %9189 = vmatprep.subr.bf16.mxu1 %v10066_v0  ;;  %9333 = vmatprep.subr.bf16.mxu0 %v10066_v0 }
 0x19e   :  { %9191 = vmatpush3.bf16.msra.mxu1 %v10258_v51  ;;  %9335 = vmatpush3.bf16.msra.mxu0 %v10258_v51 }
 0x19f   :  { %9192 = vmatprep.subr.bf16.mxu1 %v10066_v0  ;;  %9336 = vmatprep.subr.bf16.mxu0 %v10066_v0 }
 0x1a2   :  { %9194 = vmatpush3.bf16.msra.mxu1 %v10280_v60  ;;  %9338 = vmatpush3.bf16.msra.mxu0 %v10280_v60 }
 0x1a3   :  { %9195 = vmatprep.subr.bf16.mxu1 %v10066_v0  ;;  %9339 = vmatprep.subr.bf16.mxu0 %v10066_v0 }
 0x1a5   :  { %7545 = vmatmul.mubr.f32.vlgmr.msra.gmra.mrb[4].mxu1 %v2056_v47  ;;  %7755 = vmatmul.mubr.f32.vlgmr.msra.gmra.mrb[4].mxu0 %v2700_v49 }
 0x1a6   :  { %9197 = vmatpush3.bf16.msra.mxu1 %v10297_v5  ;;  %9341 = vmatpush3.bf16.msra.mxu0 %v10297_v5 }
 0x1a7   :  { %9198 = vmatprep.subr.bf16.mxu1 %v10066_v0  ;;  %9342 = vmatprep.subr.bf16.mxu0 %v10066_v0 }
 0x1a8   :  { %7579 = vmatprep.mubr.msk.f32.mxu1 %vm10067_vm0, %v10068_v8  ;;  %7789 = vmatprep.mubr.msk.f32.mxu0 %vm10067_vm0, %v10068_v8 }
 0x1aa   :  { %9200 = vmatpush3.bf16.msra.mxu1 %v10319_v20  ;;  %9344 = vmatpush3.bf16.msra.mxu0 %v10319_v20 }
 0x1ab   :  { %9201 = vmatprep.subr.bf16.mxu1 %v10066_v0  ;;  %9345 = vmatprep.subr.bf16.mxu0 %v10066_v0 }
 0x1ae   :  { %9203 = vmatpush3.bf16.msra.mxu1 %v10341_v28  ;;  %9347 = vmatpush3.bf16.msra.mxu0 %v10341_v28 }
 0x1af   :  { %9204 = vmatprep.subr.bf16.mxu1 %v10066_v0  ;;  %9348 = vmatprep.subr.bf16.mxu0 %v10066_v0 }
 0x1b2   :  { %9206 = vmatpush3.bf16.msra.mxu1 %v10367_v59  ;;  %9350 = vmatpush3.bf16.msra.mxu0 %v10367_v59 }
 0x1b3   :  { %9207 = vmatprep.subr.bf16.mxu1 %v10066_v0  ;;  %9351 = vmatprep.subr.bf16.mxu0 %v10066_v0 }
 0x1b6   :  { %9209 = vmatpush3.bf16.msra.mxu1 %v10389_v9  ;;  %9353 = vmatpush3.bf16.msra.mxu0 %v10389_v9 }
 0x1b7   :  { %9210 = vmatprep.subr.bf16.mxu1 %v10066_v0  ;;  %9354 = vmatprep.subr.bf16.mxu0 %v10066_v0 }
 0x1ba   :  { %9212 = vmatpush3.bf16.msra.mxu1 %v10401_v19  ;;  %9356 = vmatpush3.bf16.msra.mxu0 %v10401_v19 }
 0x1bb   :  { %9213 = vmatprep.subr.bf16.mxu1 %v10066_v0  ;;  %9357 = vmatprep.subr.bf16.mxu0 %v10066_v0 }
 0x1be   :  { %9215 = vmatpush3.bf16.msra.mxu1 %v10415_v30  ;;  %9359 = vmatpush3.bf16.msra.mxu0 %v10415_v30 }
 0x1bf   :  { %9216 = vmatprep.subr.bf16.mxu1 %v10066_v0  ;;  %9360 = vmatprep.subr.bf16.mxu0 %v10066_v0 }
 0x1c2   :  { %9218 = vmatpush3.bf16.msra.mxu1 %v10423_v39  ;;  %9362 = vmatpush3.bf16.msra.mxu0 %v10423_v39 }
 0x1c3   :  { %9219 = vmatprep.subr.bf16.mxu1 %v10066_v0  ;;  %9363 = vmatprep.subr.bf16.mxu0 %v10066_v0 }
 0x1c5   :  { %7580 = vmatmul.mubr.f32.vlgmr.msra.gmra.mrb[4].mxu1 %v10788_v10  ;;  %7790 = vmatmul.mubr.f32.vlgmr.msra.gmra.mrb[4].mxu0 %v10790_v16 }
 0x1c6   :  { %9221 = vmatpush3.bf16.msra.mxu1 %v10125_v12  ;;  %9365 = vmatpush3.bf16.msra.mxu0 %v10125_v12 }
 0x1c7   :  { %9222 = vmatprep.subr.bf16.mxu1 %v10066_v0  ;;  %9366 = vmatprep.subr.bf16.mxu0 %v10066_v0 }
 0x1c8   :  { %7614 = vmatprep.mubr.msk.f32.mxu1 %vm10067_vm0, %v10068_v8  ;;  %7824 = vmatprep.mubr.msk.f32.mxu0 %vm10067_vm0, %v10068_v8 }
 0x1ca   :  { %9224 = vmatpush3.bf16.msra.mxu1 %v10129_v13  ;;  %9368 = vmatpush3.bf16.msra.mxu0 %v10129_v13 }
 0x1cb   :  { %9225 = vmatprep.subr.bf16.mxu1 %v10066_v0  ;;  %9369 = vmatprep.subr.bf16.mxu0 %v10066_v0 }
 0x1ce   :  { %9227 = vmatpush3.bf16.msra.mxu1 %v10148_v18  ;;  %9371 = vmatpush3.bf16.msra.mxu0 %v10148_v18 }
 0x1cf   :  { %9228 = vmatprep.subr.bf16.mxu1 %v10066_v0  ;;  %9372 = vmatprep.subr.bf16.mxu0 %v10066_v0 }
 0x1d2   :  { %9230 = vmatpush3.bf16.msra.mxu1 %v10175_v25  ;;  %9374 = vmatpush3.bf16.msra.mxu0 %v10175_v25 }
 0x1d3   :  { %9231 = vmatprep.subr.bf16.mxu1 %v10066_v0  ;;  %9375 = vmatprep.subr.bf16.mxu0 %v10066_v0 }
 0x1d6   :  { %9233 = vmatpush3.bf16.msra.mxu1 %v10200_v32  ;;  %9377 = vmatpush3.bf16.msra.mxu0 %v10200_v32 }
 0x1d7   :  { %9234 = vmatprep.subr.bf16.mxu1 %v10066_v0  ;;  %9378 = vmatprep.subr.bf16.mxu0 %v10066_v0 }
 0x1da   :  { %9236 = vmatpush3.bf16.msra.mxu1 %v10239_v44  ;;  %9380 = vmatpush3.bf16.msra.mxu0 %v10239_v44 }
 0x1db   :  { %9237 = vmatprep.subr.bf16.mxu1 %v10066_v0  ;;  %9381 = vmatprep.subr.bf16.mxu0 %v10066_v0 }
 0x1de   :  { %9239 = vmatpush3.bf16.msra.mxu1 %v10258_v51  ;;  %9383 = vmatpush3.bf16.msra.mxu0 %v10258_v51 }
 0x1df   :  { %9240 = vmatprep.subr.bf16.mxu1 %v10066_v0  ;;  %9384 = vmatprep.subr.bf16.mxu0 %v10066_v0 }
 0x1e2   :  { %9242 = vmatpush3.bf16.msra.mxu1 %v10280_v60  ;;  %9386 = vmatpush3.bf16.msra.mxu0 %v10280_v60 }
 0x1e3   :  { %9387 = vmatprep.subr.bf16.mxu1 %v10066_v0  ;;  %9531 = vmatprep.subr.bf16.mxu0 %v10066_v0 }
 0x1e5   :  { %7615 = vmatmul.mubr.f32.vlgmr.msra.gmra.mrb[4].mxu1 %v10788_v10  ;;  %7825 = vmatmul.mubr.f32.vlgmr.msra.gmra.mrb[4].mxu0 %v10790_v16 }
 0x1e6   :  { %9389 = vmatpush3.bf16.msra.mxu1 %v10125_v12  ;;  %9533 = vmatpush3.bf16.msra.mxu0 %v10125_v12 }
 0x1e7   :  { %9390 = vmatprep.subr.bf16.mxu1 %v10066_v0  ;;  %9534 = vmatprep.subr.bf16.mxu0 %v10066_v0 }
 0x1e8   :  { %7859 = vmatprep.mubr.msk.f32.mxu1 %vm10067_vm0, %v10068_v8  ;;  %8069 = vmatprep.mubr.msk.f32.mxu0 %vm10067_vm0, %v10068_v8 }
 0x1ea   :  { %9392 = vmatpush3.bf16.msra.mxu1 %v10129_v13  ;;  %9536 = vmatpush3.bf16.msra.mxu0 %v10129_v13 }
 0x1eb   :  { %9393 = vmatprep.subr.bf16.mxu1 %v10066_v0  ;;  %9537 = vmatprep.subr.bf16.mxu0 %v10066_v0 }
 0x1ee   :  { %9395 = vmatpush3.bf16.msra.mxu1 %v10148_v18  ;;  %9539 = vmatpush3.bf16.msra.mxu0 %v10148_v18 }
 0x1ef   :  { %9396 = vmatprep.subr.bf16.mxu1 %v10066_v0  ;;  %9540 = vmatprep.subr.bf16.mxu0 %v10066_v0 }
 0x1f2   :  { %9398 = vmatpush3.bf16.msra.mxu1 %v10175_v25  ;;  %9542 = vmatpush3.bf16.msra.mxu0 %v10175_v25 }
 0x1f3   :  { %9399 = vmatprep.subr.bf16.mxu1 %v10066_v0  ;;  %9543 = vmatprep.subr.bf16.mxu0 %v10066_v0 }
 0x1f6   :  { %9401 = vmatpush3.bf16.msra.mxu1 %v10200_v32  ;;  %9545 = vmatpush3.bf16.msra.mxu0 %v10200_v32 }
 0x1f7   :  { %9402 = vmatprep.subr.bf16.mxu1 %v10066_v0  ;;  %9546 = vmatprep.subr.bf16.mxu0 %v10066_v0 }
 0x1f8   :  { %v1322_v62 = vpop.f32.mrb[2].mxu1  ;;  %v1966_v1 = vpop.f32.mrb[2].mxu0 }
 0x1f9   :  { %v1326_v6 = vmax.f32 %v1322_v62, 1e-16  ;;  %v1970_v7 = vmax.f32 %v1966_v1, 1e-16  ;;  %v7196_v10 = vpop.f32.mrb[3].mxu1  ;;  %v7406_v16 = vpop.f32.mrb[3].mxu0 }
 0x1fa   :  { %9404 = vmatpush3.bf16.msra.mxu1 %v10239_v44  ;;  %9548 = vmatpush3.bf16.msra.mxu0 %v10239_v44 }
 0x1fb   :  { %10057 = vrsqrt.f32 %v1326_v6  ;;  %9405 = vmatprep.subr.bf16.mxu1 %v10066_v0  ;;  %9549 = vmatprep.subr.bf16.mxu0 %v10066_v0 }
 0x1fc   :  { %10059 = vrsqrt.f32 %v1970_v7 }
 0x1fe   :  { %9407 = vmatpush3.bf16.msra.mxu1 %v10258_v51  ;;  %9551 = vmatpush3.bf16.msra.mxu0 %v10258_v51 }
 0x1ff   :  { %9408 = vmatprep.subr.bf16.mxu1 %v10066_v0  ;;  %9552 = vmatprep.subr.bf16.mxu0 %v10066_v0 }
 0x202   :  { %9410 = vmatpush3.bf16.msra.mxu1 %v10280_v60  ;;  %9554 = vmatpush3.bf16.msra.mxu0 %v10280_v60 }
 0x203   :  { %9411 = vmatprep.subr.bf16.mxu1 %v10066_v0  ;;  %9555 = vmatprep.subr.bf16.mxu0 %v10066_v0 }
 0x205   :  { %v10058_v22 = vpop.eup %10057  ;;  %7860 = vmatmul.mubr.f32.vlgmr.msra.gmra.mrb[6].mxu1 %v3348_v48  ;;  %8070 = vmatmul.mubr.f32.vlgmr.msra.gmra.mrb[6].mxu0 %v3994_v45 }
 0x206   :  { %v11086_v24 = vpop.eup %10059  ;;  %9413 = vmatpush3.bf16.msra.mxu1 %v10312_v15  ;;  %9557 = vmatpush3.bf16.msra.mxu0 %v10312_v15  ;;  %v11091_v47 = vmul.f32 %v10058_v22, %v11084_v52 }
 0x207   :  { %9414 = vmatprep.subr.bf16.mxu1 %v10066_v0  ;;  %9558 = vmatprep.subr.bf16.mxu0 %v10066_v0  ;;  %v11097_v49 = vmul.f32 %v11086_v24, %v11084_v52  ;;  %v11100_v33 = vmul.f32 %v11086_v24, %v10058_v22 }
 0x208   :  { %7894 = vmatprep.mubr.msk.f32.mxu1 %vm10067_vm0, %v10068_v8  ;;  %8104 = vmatprep.mubr.msk.f32.mxu0 %vm10067_vm0, %v10068_v8 }
 0x20a   :  { %9416 = vmatpush3.bf16.msra.mxu1 %v10335_v46  ;;  %9560 = vmatpush3.bf16.msra.mxu0 %v10335_v46 }
 0x20b   :  { %9417 = vmatprep.subr.bf16.mxu1 %v10066_v0  ;;  %9561 = vmatprep.subr.bf16.mxu0 %v10066_v0 }
 0x20e   :  { %9419 = vmatpush3.bf16.msra.mxu1 %v10358_v34  ;;  %9563 = vmatpush3.bf16.msra.mxu0 %v10358_v34 }
 0x20f   :  { %9420 = vmatprep.subr.bf16.mxu1 %v10066_v0  ;;  %9564 = vmatprep.subr.bf16.mxu0 %v10066_v0 }
 0x212   :  { %9422 = vmatpush3.bf16.msra.mxu1 %v10374_v35  ;;  %9566 = vmatpush3.bf16.msra.mxu0 %v10374_v35 }
 0x213   :  { %9423 = vmatprep.subr.bf16.mxu1 %v10066_v0  ;;  %9567 = vmatprep.subr.bf16.mxu0 %v10066_v0 }
 0x216   :  { %9425 = vmatpush3.bf16.msra.mxu1 %v10394_v41  ;;  %9569 = vmatpush3.bf16.msra.mxu0 %v10394_v41 }
 0x217   :  { %9426 = vmatprep.subr.bf16.mxu1 %v10066_v0  ;;  %9570 = vmatprep.subr.bf16.mxu0 %v10066_v0 }
 0x21a   :  { %9428 = vmatpush3.bf16.msra.mxu1 %v10405_v23  ;;  %9572 = vmatpush3.bf16.msra.mxu0 %v10405_v23 }
 0x21b   :  { %9429 = vmatprep.subr.bf16.mxu1 %v10066_v0  ;;  %9573 = vmatprep.subr.bf16.mxu0 %v10066_v0 }
 0x21e   :  { %9431 = vmatpush3.bf16.msra.mxu1 %v10413_v53  ;;  %9575 = vmatpush3.bf16.msra.mxu0 %v10413_v53 }
 0x21f   :  { %9432 = vmatprep.subr.bf16.mxu1 %v10066_v0  ;;  %9576 = vmatprep.subr.bf16.mxu0 %v10066_v0 }
 0x222   :  { %9434 = vmatpush3.bf16.msra.mxu1 %v10421_v55  ;;  %9578 = vmatpush3.bf16.msra.mxu0 %v10421_v55 }
 0x223   :  { %9435 = vmatprep.subr.bf16.mxu1 %v10066_v0  ;;  %9579 = vmatprep.subr.bf16.mxu0 %v10066_v0 }
 0x225   :  { %7895 = vmatmul.mubr.f32.vlgmr.msra.gmra.mrb[6].mxu1 %v11045_v26  ;;  %8105 = vmatmul.mubr.f32.vlgmr.msra.gmra.mrb[6].mxu0 %v11047_v27 }
 0x226   :  { %9437 = vmatpush3.bf16.msra.mxu1 %v10431_v56  ;;  %9581 = vmatpush3.bf16.msra.mxu0 %v10431_v56 }
 0x227   :  { %9438 = vmatprep.subr.bf16.mxu1 %v10066_v0  ;;  %9582 = vmatprep.subr.bf16.mxu0 %v10066_v0 }
 0x228   :  { %7929 = vmatprep.mubr.msk.f32.mxu1 %vm10067_vm0, %v10068_v8  ;;  %8139 = vmatprep.mubr.msk.f32.mxu0 %vm10067_vm0, %v10068_v8 }
 0x22a   :  { %9440 = vmatpush3.bf16.msra.mxu1 %v10441_v61  ;;  %9584 = vmatpush3.bf16.msra.mxu0 %v10441_v61 }
 0x22b   :  { %9441 = vmatprep.subr.bf16.mxu1 %v10066_v0  ;;  %9585 = vmatprep.subr.bf16.mxu0 %v10066_v0 }
 0x22e   :  { %9443 = vmatpush3.bf16.msra.mxu1 %v10453_v36  ;;  %9587 = vmatpush3.bf16.msra.mxu0 %v10453_v36 }
 0x22f   :  { %9444 = vmatprep.subr.bf16.mxu1 %v10066_v0  ;;  %9588 = vmatprep.subr.bf16.mxu0 %v10066_v0 }
 0x232   :  { %9446 = vmatpush3.bf16.msra.mxu1 %v10461_v37  ;;  %9590 = vmatpush3.bf16.msra.mxu0 %v10461_v37 }
 0x233   :  { %9447 = vmatprep.subr.bf16.mxu1 %v10066_v0  ;;  %9591 = vmatprep.subr.bf16.mxu0 %v10066_v0 }
 0x236   :  { %9449 = vmatpush3.bf16.msra.mxu1 %v10469_v38  ;;  %9593 = vmatpush3.bf16.msra.mxu0 %v10469_v38 }
 0x237   :  { %9450 = vmatprep.subr.bf16.mxu1 %v10066_v0  ;;  %9594 = vmatprep.subr.bf16.mxu0 %v10066_v0 }
 0x23a   :  { %9452 = vmatpush3.bf16.msra.mxu1 %v10477_v43  ;;  %9596 = vmatpush3.bf16.msra.mxu0 %v10477_v43 }
 0x23b   :  { %9453 = vmatprep.subr.bf16.mxu1 %v10066_v0  ;;  %9597 = vmatprep.subr.bf16.mxu0 %v10066_v0 }
 0x23e   :  { %9455 = vmatpush3.bf16.msra.mxu1 %v10485_v50  ;;  %9599 = vmatpush3.bf16.msra.mxu0 %v10485_v50 }
 0x23f   :  { %9456 = vmatprep.subr.bf16.mxu1 %v10066_v0  ;;  %9600 = vmatprep.subr.bf16.mxu0 %v10066_v0 }
 0x242   :  { %9458 = vmatpush3.bf16.msra.mxu1 %v10493_v57  ;;  %9602 = vmatpush3.bf16.msra.mxu0 %v10493_v57 }
 0x243   :  { %9459 = vmatprep.subr.bf16.mxu1 %v10066_v0  ;;  %9603 = vmatprep.subr.bf16.mxu0 %v10066_v0 }
 0x245   :  { %7930 = vmatmul.mubr.f32.vlgmr.msra.gmra.mrb[6].mxu1 %v11054_v42  ;;  %8140 = vmatmul.mubr.f32.vlgmr.msra.gmra.mrb[6].mxu0 %v11057_v29 }
 0x246   :  { %9461 = vmatpush3.bf16.msra.mxu1 %v10125_v12  ;;  %9605 = vmatpush3.bf16.msra.mxu0 %v10125_v12 }
 0x247   :  { %9462 = vmatprep.subr.bf16.mxu1 %v10066_v0  ;;  %9606 = vmatprep.subr.bf16.mxu0 %v10066_v0 }
 0x248   :  { %7964 = vmatprep.mubr.msk.f32.mxu1 %vm10067_vm0, %v10068_v8  ;;  %8174 = vmatprep.mubr.msk.f32.mxu0 %vm10067_vm0, %v10068_v8 }
 0x24a   :  { %9464 = vmatpush3.bf16.msra.mxu1 %v10129_v13  ;;  %9608 = vmatpush3.bf16.msra.mxu0 %v10129_v13 }
 0x24b   :  { %9465 = vmatprep.subr.bf16.mxu1 %v10066_v0  ;;  %9609 = vmatprep.subr.bf16.mxu0 %v10066_v0 }
 0x24e   :  { %9467 = vmatpush3.bf16.msra.mxu1 %v10148_v18  ;;  %9611 = vmatpush3.bf16.msra.mxu0 %v10148_v18 }
 0x24f   :  { %9468 = vmatprep.subr.bf16.mxu1 %v10066_v0  ;;  %9612 = vmatprep.subr.bf16.mxu0 %v10066_v0 }
 0x252   :  { %9470 = vmatpush3.bf16.msra.mxu1 %v10175_v25  ;;  %9614 = vmatpush3.bf16.msra.mxu0 %v10175_v25 }
 0x253   :  { %9471 = vmatprep.subr.bf16.mxu1 %v10066_v0  ;;  %9615 = vmatprep.subr.bf16.mxu0 %v10066_v0 }
 0x256   :  { %9473 = vmatpush3.bf16.msra.mxu1 %v10200_v32  ;;  %9617 = vmatpush3.bf16.msra.mxu0 %v10200_v32 }
 0x257   :  { %9474 = vmatprep.subr.bf16.mxu1 %v10066_v0  ;;  %9618 = vmatprep.subr.bf16.mxu0 %v10066_v0 }
 0x25a   :  { %9476 = vmatpush3.bf16.msra.mxu1 %v10239_v44  ;;  %9620 = vmatpush3.bf16.msra.mxu0 %v10239_v44 }
 0x25b   :  { %9477 = vmatprep.subr.bf16.mxu1 %v10066_v0  ;;  %9621 = vmatprep.subr.bf16.mxu0 %v10066_v0 }
 0x25e   :  { %9479 = vmatpush3.bf16.msra.mxu1 %v10258_v51  ;;  %9623 = vmatpush3.bf16.msra.mxu0 %v10258_v51 }
 0x25f   :  { %9480 = vmatprep.subr.bf16.mxu1 %v10066_v0  ;;  %9624 = vmatprep.subr.bf16.mxu0 %v10066_v0 }
 0x262   :  { %9482 = vmatpush3.bf16.msra.mxu1 %v10280_v60  ;;  %9626 = vmatpush3.bf16.msra.mxu0 %v10280_v60 }
 0x263   :  { %9483 = vmatprep.subr.bf16.mxu1 %v10066_v0  ;;  %9627 = vmatprep.subr.bf16.mxu0 %v10066_v0 }
 0x265   :  { %7965 = vmatmul.mubr.f32.vlgmr.msra.gmra.mrb[6].mxu1 %v3346_v2  ;;  %8175 = vmatmul.mubr.f32.vlgmr.msra.gmra.mrb[6].mxu0 %v3992_v3  ;;  %v4638_v3 = vand.u32 4294901760, %v11323_v11 }
 0x266   :  { %9485 = vmatpush3.bf16.msra.mxu1 %v10297_v5  ;;  %9629 = vmatpush3.bf16.msra.mxu0 %v10297_v5 }
 0x267   :  { %9486 = vmatprep.subr.bf16.mxu1 %v10066_v0  ;;  %9630 = vmatprep.subr.bf16.mxu0 %v10066_v0  ;;  %v4639_v7 = vsub.f32 %v11323_v11, %v4638_v3 }
 0x268   :  { %7999 = vmatprep.mubr.msk.f32.mxu1 %vm10067_vm0, %v10068_v8  ;;  %8209 = vmatprep.mubr.msk.f32.mxu0 %vm10067_vm0, %v10068_v8 }
 0x269   :  { %v4640_v16 = vand.u32 4294901760, %v4639_v7 }
 0x26a   :  { %9488 = vmatpush3.bf16.msra.mxu1 %v10319_v20  ;;  %9632 = vmatpush3.bf16.msra.mxu0 %v10319_v20 }
 0x26b   :  { %9489 = vmatprep.subr.bf16.mxu1 %v10066_v0  ;;  %9633 = vmatprep.subr.bf16.mxu0 %v10066_v0 }
 0x26e   :  { %9491 = vmatpush3.bf16.msra.mxu1 %v10341_v28  ;;  %9635 = vmatpush3.bf16.msra.mxu0 %v10341_v28 }
 0x26f   :  { %9492 = vmatprep.subr.bf16.mxu1 %v10066_v0  ;;  %9636 = vmatprep.subr.bf16.mxu0 %v10066_v0 }
 0x272   :  { %9494 = vmatpush3.bf16.msra.mxu1 %v10367_v59  ;;  %9638 = vmatpush3.bf16.msra.mxu0 %v10367_v59 }
 0x273   :  { %9495 = vmatprep.subr.bf16.mxu1 %v10066_v0  ;;  %9639 = vmatprep.subr.bf16.mxu0 %v10066_v0 }
 0x276   :  { %9497 = vmatpush3.bf16.msra.mxu1 %v10389_v9  ;;  %9641 = vmatpush3.bf16.msra.mxu0 %v10389_v9 }
 0x277   :  { %9498 = vmatprep.subr.bf16.mxu1 %v10066_v0  ;;  %9642 = vmatprep.subr.bf16.mxu0 %v10066_v0 }
 0x27a   :  { %9500 = vmatpush3.bf16.msra.mxu1 %v10401_v19  ;;  %9644 = vmatpush3.bf16.msra.mxu0 %v10401_v19 }
 0x27b   :  { %9501 = vmatprep.subr.bf16.mxu1 %v10066_v0  ;;  %9645 = vmatprep.subr.bf16.mxu0 %v10066_v0 }
 0x27e   :  { %9503 = vmatpush3.bf16.msra.mxu1 %v10415_v30  ;;  %9647 = vmatpush3.bf16.msra.mxu0 %v10415_v30 }
 0x27f   :  { %9504 = vmatprep.subr.bf16.mxu1 %v10066_v0  ;;  %9648 = vmatprep.subr.bf16.mxu0 %v10066_v0 }
 0x282   :  { %9506 = vmatpush3.bf16.msra.mxu1 %v10423_v39  ;;  %9650 = vmatpush3.bf16.msra.mxu0 %v10423_v39 }
 0x283   :  { %9507 = vmatprep.subr.bf16.mxu1 %v10066_v0  ;;  %9651 = vmatprep.subr.bf16.mxu0 %v10066_v0 }
 0x285   :  { %8000 = vmatmul.mubr.f32.vlgmr.msra.gmra.mrb[6].mxu1 %v11045_v26  ;;  %8210 = vmatmul.mubr.f32.vlgmr.msra.gmra.mrb[6].mxu0 %v11047_v27 }
 0x286   :  { %9509 = vmatpush3.bf16.msra.mxu1 %v10125_v12  ;;  %9653 = vmatpush3.bf16.msra.mxu0 %v10125_v12 }
 0x287   :  { %9510 = vmatprep.subr.bf16.mxu1 %v10066_v0  ;;  %9654 = vmatprep.subr.bf16.mxu0 %v10066_v0 }
 0x288   :  { %8034 = vmatprep.mubr.msk.f32.mxu1 %vm10067_vm0, %v10068_v8  ;;  %8244 = vmatprep.mubr.msk.f32.mxu0 %vm10067_vm0, %v10068_v8 }
 0x28a   :  { %9512 = vmatpush3.bf16.msra.mxu1 %v10129_v13  ;;  %9656 = vmatpush3.bf16.msra.mxu0 %v10129_v13 }
 0x28b   :  { %9513 = vmatprep.subr.bf16.mxu1 %v10066_v0  ;;  %9657 = vmatprep.subr.bf16.mxu0 %v10066_v0 }
 0x28e   :  { %9515 = vmatpush3.bf16.msra.mxu1 %v10148_v18  ;;  %9659 = vmatpush3.bf16.msra.mxu0 %v10148_v18 }
 0x28f   :  { %9516 = vmatprep.subr.bf16.mxu1 %v10066_v0  ;;  %9660 = vmatprep.subr.bf16.mxu0 %v10066_v0 }
 0x292   :  { %9518 = vmatpush3.bf16.msra.mxu1 %v10175_v25  ;;  %9662 = vmatpush3.bf16.msra.mxu0 %v10175_v25 }
 0x293   :  { %9519 = vmatprep.subr.bf16.mxu1 %v10066_v0  ;;  %9663 = vmatprep.subr.bf16.mxu0 %v10066_v0 }
 0x296   :  { %9521 = vmatpush3.bf16.msra.mxu1 %v10200_v32  ;;  %9665 = vmatpush3.bf16.msra.mxu0 %v10200_v32 }
 0x297   :  { %9522 = vmatprep.subr.bf16.mxu1 %v10066_v0  ;;  %9666 = vmatprep.subr.bf16.mxu0 %v10066_v0 }
 0x29a   :  { %9524 = vmatpush3.bf16.msra.mxu1 %v10239_v44  ;;  %9668 = vmatpush3.bf16.msra.mxu0 %v10239_v44 }
 0x29b   :  { %9525 = vmatprep.subr.bf16.mxu1 %v10066_v0  ;;  %9669 = vmatprep.subr.bf16.mxu0 %v10066_v0 }
 0x29e   :  { %9527 = vmatpush3.bf16.msra.mxu1 %v10258_v51  ;;  %9671 = vmatpush3.bf16.msra.mxu0 %v10258_v51 }
 0x29f   :  { %9528 = vmatprep.subr.bf16.mxu1 %v10066_v0  ;;  %9672 = vmatprep.subr.bf16.mxu0 %v10066_v0 }
 0x2a2   :  { %9530 = vmatpush3.bf16.msra.mxu1 %v10280_v60  ;;  %9674 = vmatpush3.bf16.msra.mxu0 %v10280_v60 }
 0x2a3   :  { %9675 = vmatprep.subr.bf16.mxu1 %v10066_v0  ;;  %9819 = vmatprep.subr.bf16.mxu0 %v10066_v0 }
 0x2a5   :  { %8035 = vmatmul.mubr.f32.vlgmr.msra.gmra.mrb[6].mxu1 %v11045_v26  ;;  %8245 = vmatmul.mubr.f32.vlgmr.msra.gmra.mrb[6].mxu0 %v11047_v27  ;;  %v11326_v26 = vsub.f32 %v5200_v4, %v11316_v40  ;;  %v3259_v27 = vmin.f32 %v11091_v47, 1e+08 }
 0x2a6   :  { %9677 = vmatpush3.bf16.msra.mxu1 %v10125_v12  ;;  %9821 = vmatpush3.bf16.msra.mxu0 %v10125_v12 }
 0x2a7   :  { %9678 = vmatprep.subr.bf16.mxu1 %v10066_v0  ;;  %9822 = vmatprep.subr.bf16.mxu0 %v10066_v0  ;;  %v5284_v6 = vand.u32 4294901760, %v11326_v26 }
 0x2a8   :  { %8279 = vmatprep.mubr.msk.f32.mxu1 %vm10067_vm0, %v10068_v8  ;;  %8489 = vmatprep.mubr.msk.f32.mxu0 %vm10067_vm0, %v10068_v8 }
 0x2a9   :  { %v5285_v10 = vsub.f32 %v11326_v26, %v5284_v6 }
 0x2aa   :  { %9680 = vmatpush3.bf16.msra.mxu1 %v10129_v13  ;;  %9824 = vmatpush3.bf16.msra.mxu0 %v10129_v13 }
 0x2ab   :  { %9681 = vmatprep.subr.bf16.mxu1 %v10066_v0  ;;  %9825 = vmatprep.subr.bf16.mxu0 %v10066_v0  ;;  %v5286_v21 = vand.u32 4294901760, %v5285_v10 }
 0x2ae   :  { %9683 = vmatpush3.bf16.msra.mxu1 %v10148_v18  ;;  %9827 = vmatpush3.bf16.msra.mxu0 %v10148_v18 }
 0x2af   :  { %9684 = vmatprep.subr.bf16.mxu1 %v10066_v0  ;;  %9828 = vmatprep.subr.bf16.mxu0 %v10066_v0 }
 0x2b2   :  { %9686 = vmatpush3.bf16.msra.mxu1 %v10175_v25  ;;  %9830 = vmatpush3.bf16.msra.mxu0 %v10175_v25 }
 0x2b3   :  { %9687 = vmatprep.subr.bf16.mxu1 %v10066_v0  ;;  %9831 = vmatprep.subr.bf16.mxu0 %v10066_v0 }
 0x2b6   :  { %9689 = vmatpush3.bf16.msra.mxu1 %v10200_v32  ;;  %9833 = vmatpush3.bf16.msra.mxu0 %v10200_v32 }
 0x2b7   :  { %9690 = vmatprep.subr.bf16.mxu1 %v10066_v0  ;;  %9834 = vmatprep.subr.bf16.mxu0 %v10066_v0 }
 0x2b8   :  { %v2610_v42 = vpop.f32.mrb[4].mxu1  ;;  %v3254_v29 = vpop.f32.mrb[4].mxu0 }
 0x2b9   :  { %v2614_v58 = vmax.f32 %v2610_v42, 1e-16  ;;  %v11333_v62 = vmul.f32 %v3259_v27, %v3254_v29  ;;  %v7616_v1 = vpop.f32.mrb[5].mxu1  ;;  %v7826_v2 = vpop.f32.mrb[5].mxu0 }
 0x2ba   :  { %9692 = vmatpush3.bf16.msra.mxu1 %v10239_v44  ;;  %9836 = vmatpush3.bf16.msra.mxu0 %v10239_v44 }
 0x2bb   :  { %10061 = vrsqrt.f32 %v2614_v58  ;;  %9693 = vmatprep.subr.bf16.mxu1 %v10066_v0  ;;  %9837 = vmatprep.subr.bf16.mxu0 %v10066_v0 }
 0x2be   :  { %9695 = vmatpush3.bf16.msra.mxu1 %v10258_v51  ;;  %9839 = vmatpush3.bf16.msra.mxu0 %v10258_v51 }
 0x2bf   :  { %9696 = vmatprep.subr.bf16.mxu1 %v10066_v0  ;;  %9840 = vmatprep.subr.bf16.mxu0 %v10066_v0 }
 0x2c2   :  { %9698 = vmatpush3.bf16.msra.mxu1 %v10280_v60  ;;  %9842 = vmatpush3.bf16.msra.mxu0 %v10280_v60 }
 0x2c3   :  { %9699 = vmatprep.subr.bf16.mxu1 %v10066_v0  ;;  %9843 = vmatprep.subr.bf16.mxu0 %v10066_v0 }
 0x2c5   :  { %v10062_v17 = vpop.eup %10061  ;;  %8280 = vmatmul.mubr.f32.vlgmr.msra.gmra.mrb[8].mxu1 %v4640_v16  ;;  %8490 = vmatmul.mubr.f32.vlgmr.msra.gmra.mrb[8].mxu0 %v5286_v21 }
 0x2c6   :  { %9701 = vmatpush3.bf16.msra.mxu1 %v10312_v15  ;;  %9845 = vmatpush3.bf16.msra.mxu0 %v10312_v15  ;;  %v11358_v48 = vmul.f32 %v10062_v17, %v11086_v24  ;;  %v11361_v45 = vmul.f32 %v10062_v17, %v11084_v52 }
 0x2c7   :  { %9702 = vmatprep.subr.bf16.mxu1 %v10066_v0  ;;  %9846 = vmatprep.subr.bf16.mxu0 %v10066_v0 }
 0x2c8   :  { %8314 = vmatprep.mubr.msk.f32.mxu1 %vm10067_vm0, %v10068_v8  ;;  %8524 = vmatprep.mubr.msk.f32.mxu0 %vm10067_vm0, %v10068_v8 }
 0x2ca   :  { %9704 = vmatpush3.bf16.msra.mxu1 %v10335_v46  ;;  %9848 = vmatpush3.bf16.msra.mxu0 %v10335_v46  ;;  %v5197_v46 = vmin.f32 %v11361_v45, 1e+08 }
 0x2cb   :  { %9705 = vmatprep.subr.bf16.mxu1 %v10066_v0  ;;  %9849 = vmatprep.subr.bf16.mxu0 %v10066_v0 }
 0x2ce   :  { %9707 = vmatpush3.bf16.msra.mxu1 %v10358_v34  ;;  %9851 = vmatpush3.bf16.msra.mxu0 %v10358_v34 }
 0x2cf   :  { %9708 = vmatprep.subr.bf16.mxu1 %v10066_v0  ;;  %9852 = vmatprep.subr.bf16.mxu0 %v10066_v0 }
 0x2d2   :  { %9710 = vmatpush3.bf16.msra.mxu1 %v10374_v35  ;;  %9854 = vmatpush3.bf16.msra.mxu0 %v10374_v35 }
 0x2d3   :  { %9711 = vmatprep.subr.bf16.mxu1 %v10066_v0  ;;  %9855 = vmatprep.subr.bf16.mxu0 %v10066_v0 }
 0x2d6   :  { %9713 = vmatpush3.bf16.msra.mxu1 %v10394_v41  ;;  %9857 = vmatpush3.bf16.msra.mxu0 %v10394_v41 }
 0x2d7   :  { %9714 = vmatprep.subr.bf16.mxu1 %v10066_v0  ;;  %9858 = vmatprep.subr.bf16.mxu0 %v10066_v0 }
 0x2da   :  { %9716 = vmatpush3.bf16.msra.mxu1 %v10405_v23  ;;  %9860 = vmatpush3.bf16.msra.mxu0 %v10405_v23 }
 0x2db   :  { %9717 = vmatprep.subr.bf16.mxu1 %v10066_v0  ;;  %9861 = vmatprep.subr.bf16.mxu0 %v10066_v0 }
 0x2de   :  { %9719 = vmatpush3.bf16.msra.mxu1 %v10413_v53  ;;  %9863 = vmatpush3.bf16.msra.mxu0 %v10413_v53 }
 0x2df   :  { %9720 = vmatprep.subr.bf16.mxu1 %v10066_v0  ;;  %9864 = vmatprep.subr.bf16.mxu0 %v10066_v0 }
 0x2e2   :  { %9722 = vmatpush3.bf16.msra.mxu1 %v10421_v55  ;;  %9866 = vmatpush3.bf16.msra.mxu0 %v10421_v55 }
 0x2e3   :  { %9723 = vmatprep.subr.bf16.mxu1 %v10066_v0  ;;  %9867 = vmatprep.subr.bf16.mxu0 %v10066_v0 }
 0x2e5   :  { %8315 = vmatmul.mubr.f32.vlgmr.msra.gmra.mrb[8].mxu1 %v11314_v14  ;;  %8525 = vmatmul.mubr.f32.vlgmr.msra.gmra.mrb[8].mxu0 %v11316_v40 }
 0x2e6   :  { %9725 = vmatpush3.bf16.msra.mxu1 %v10431_v56  ;;  %9869 = vmatpush3.bf16.msra.mxu0 %v10431_v56 }
 0x2e7   :  { %9726 = vmatprep.subr.bf16.mxu1 %v10066_v0  ;;  %9870 = vmatprep.subr.bf16.mxu0 %v10066_v0 }
 0x2e8   :  { %8349 = vmatprep.mubr.msk.f32.mxu1 %vm10067_vm0, %v10068_v8  ;;  %8559 = vmatprep.mubr.msk.f32.mxu0 %vm10067_vm0, %v10068_v8 }
 0x2ea   :  { %9728 = vmatpush3.bf16.msra.mxu1 %v10441_v61  ;;  %9872 = vmatpush3.bf16.msra.mxu0 %v10441_v61 }
 0x2eb   :  { %9729 = vmatprep.subr.bf16.mxu1 %v10066_v0  ;;  %9873 = vmatprep.subr.bf16.mxu0 %v10066_v0 }
 0x2ee   :  { %9731 = vmatpush3.bf16.msra.mxu1 %v10453_v36  ;;  %9875 = vmatpush3.bf16.msra.mxu0 %v10453_v36 }
 0x2ef   :  { %9732 = vmatprep.subr.bf16.mxu1 %v10066_v0  ;;  %9876 = vmatprep.subr.bf16.mxu0 %v10066_v0 }
 0x2f2   :  { %9734 = vmatpush3.bf16.msra.mxu1 %v10461_v37  ;;  %9878 = vmatpush3.bf16.msra.mxu0 %v10461_v37 }
 0x2f3   :  { %9735 = vmatprep.subr.bf16.mxu1 %v10066_v0  ;;  %9879 = vmatprep.subr.bf16.mxu0 %v10066_v0 }
 0x2f6   :  { %9737 = vmatpush3.bf16.msra.mxu1 %v10469_v38  ;;  %9881 = vmatpush3.bf16.msra.mxu0 %v10469_v38 }
 0x2f7   :  { %9738 = vmatprep.subr.bf16.mxu1 %v10066_v0  ;;  %9882 = vmatprep.subr.bf16.mxu0 %v10066_v0 }
 0x2fa   :  { %9740 = vmatpush3.bf16.msra.mxu1 %v10477_v43  ;;  %9884 = vmatpush3.bf16.msra.mxu0 %v10477_v43 }
 0x2fb   :  { %9741 = vmatprep.subr.bf16.mxu1 %v10066_v0  ;;  %9885 = vmatprep.subr.bf16.mxu0 %v10066_v0 }
 0x2fe   :  { %9743 = vmatpush3.bf16.msra.mxu1 %v10485_v50  ;;  %9887 = vmatpush3.bf16.msra.mxu0 %v10485_v50 }
 0x2ff   :  { %9744 = vmatprep.subr.bf16.mxu1 %v10066_v0  ;;  %9888 = vmatprep.subr.bf16.mxu0 %v10066_v0 }
 0x302   :  { %9746 = vmatpush3.bf16.msra.mxu1 %v10493_v57  ;;  %9890 = vmatpush3.bf16.msra.mxu0 %v10493_v57 }
 0x303   :  { %9747 = vmatprep.subr.bf16.mxu1 %v10066_v0  ;;  %9891 = vmatprep.subr.bf16.mxu0 %v10066_v0 }
 0x305   :  { %8350 = vmatmul.mubr.f32.vlgmr.msra.gmra.mrb[8].mxu1 %v11323_v11  ;;  %8560 = vmatmul.mubr.f32.vlgmr.msra.gmra.mrb[8].mxu0 %v11326_v26 }
 0x306   :  { %9749 = vmatpush3.bf16.msra.mxu1 %v10125_v12  ;;  %9893 = vmatpush3.bf16.msra.mxu0 %v10125_v12 }
 0x307   :  { %9750 = vmatprep.subr.bf16.mxu1 %v10066_v0  ;;  %9894 = vmatprep.subr.bf16.mxu0 %v10066_v0 }
 0x308   :  { %8384 = vmatprep.mubr.msk.f32.mxu1 %vm10067_vm0, %v10068_v8  ;;  %8594 = vmatprep.mubr.msk.f32.mxu0 %vm10067_vm0, %v10068_v8 }
 0x30a   :  { %9752 = vmatpush3.bf16.msra.mxu1 %v10129_v13  ;;  %9896 = vmatpush3.bf16.msra.mxu0 %v10129_v13 }
 0x30b   :  { %9753 = vmatprep.subr.bf16.mxu1 %v10066_v0  ;;  %9897 = vmatprep.subr.bf16.mxu0 %v10066_v0 }
 0x30e   :  { %9755 = vmatpush3.bf16.msra.mxu1 %v10148_v18  ;;  %9899 = vmatpush3.bf16.msra.mxu0 %v10148_v18 }
 0x30f   :  { %9756 = vmatprep.subr.bf16.mxu1 %v10066_v0  ;;  %9900 = vmatprep.subr.bf16.mxu0 %v10066_v0 }
 0x312   :  { %9758 = vmatpush3.bf16.msra.mxu1 %v10175_v25  ;;  %9902 = vmatpush3.bf16.msra.mxu0 %v10175_v25 }
 0x313   :  { %9759 = vmatprep.subr.bf16.mxu1 %v10066_v0  ;;  %9903 = vmatprep.subr.bf16.mxu0 %v10066_v0 }
 0x316   :  { %9761 = vmatpush3.bf16.msra.mxu1 %v10200_v32  ;;  %9905 = vmatpush3.bf16.msra.mxu0 %v10200_v32 }
 0x317   :  { %9762 = vmatprep.subr.bf16.mxu1 %v10066_v0  ;;  %9906 = vmatprep.subr.bf16.mxu0 %v10066_v0 }
 0x31a   :  { %9764 = vmatpush3.bf16.msra.mxu1 %v10239_v44  ;;  %9908 = vmatpush3.bf16.msra.mxu0 %v10239_v44 }
 0x31b   :  { %9765 = vmatprep.subr.bf16.mxu1 %v10066_v0  ;;  %9909 = vmatprep.subr.bf16.mxu0 %v10066_v0 }
 0x31e   :  { %9767 = vmatpush3.bf16.msra.mxu1 %v10258_v51  ;;  %9911 = vmatpush3.bf16.msra.mxu0 %v10258_v51 }
 0x31f   :  { %9768 = vmatprep.subr.bf16.mxu1 %v10066_v0  ;;  %9912 = vmatprep.subr.bf16.mxu0 %v10066_v0 }
 0x322   :  { %9770 = vmatpush3.bf16.msra.mxu1 %v10280_v60  ;;  %9914 = vmatpush3.bf16.msra.mxu0 %v10280_v60 }
 0x323   :  { %9771 = vmatprep.subr.bf16.mxu1 %v10066_v0  ;;  %9915 = vmatprep.subr.bf16.mxu0 %v10066_v0 }
 0x325   :  { %8385 = vmatmul.mubr.f32.vlgmr.msra.gmra.mrb[8].mxu1 %v4638_v3  ;;  %8595 = vmatmul.mubr.f32.vlgmr.msra.gmra.mrb[8].mxu0 %v5284_v6 }
 0x326   :  { %9773 = vmatpush3.bf16.msra.mxu1 %v10297_v5  ;;  %9917 = vmatpush3.bf16.msra.mxu0 %v10297_v5 }
 0x327   :  { %9774 = vmatprep.subr.bf16.mxu1 %v10066_v0  ;;  %9918 = vmatprep.subr.bf16.mxu0 %v10066_v0 }
 0x328   :  { %8419 = vmatprep.mubr.msk.f32.mxu1 %vm10067_vm0, %v10068_v8  ;;  %8629 = vmatprep.mubr.msk.f32.mxu0 %vm10067_vm0, %v10068_v8 }
 0x32a   :  { %9776 = vmatpush3.bf16.msra.mxu1 %v10319_v20  ;;  %9920 = vmatpush3.bf16.msra.mxu0 %v10319_v20 }
 0x32b   :  { %9777 = vmatprep.subr.bf16.mxu1 %v10066_v0  ;;  %9921 = vmatprep.subr.bf16.mxu0 %v10066_v0 }
 0x32e   :  { %9779 = vmatpush3.bf16.msra.mxu1 %v10341_v28  ;;  %9923 = vmatpush3.bf16.msra.mxu0 %v10341_v28  ;;  %v5843_v28 = vmin.f32 %v11100_v33, 1e+08 }
 0x32f   :  { %9780 = vmatprep.subr.bf16.mxu1 %v10066_v0  ;;  %9924 = vmatprep.subr.bf16.mxu0 %v10066_v0 }
 0x332   :  { %9782 = vmatpush3.bf16.msra.mxu1 %v10367_v59  ;;  %9926 = vmatpush3.bf16.msra.mxu0 %v10367_v59 }
 0x333   :  { %9783 = vmatprep.subr.bf16.mxu1 %v10066_v0  ;;  %9927 = vmatprep.subr.bf16.mxu0 %v10066_v0 }
 0x336   :  { %9785 = vmatpush3.bf16.msra.mxu1 %v10389_v9  ;;  %9929 = vmatpush3.bf16.msra.mxu0 %v10389_v9 }
 0x337   :  { %9786 = vmatprep.subr.bf16.mxu1 %v10066_v0  ;;  %9930 = vmatprep.subr.bf16.mxu0 %v10066_v0 }
 0x33a   :  { %9788 = vmatpush3.bf16.msra.mxu1 %v10401_v19  ;;  %9932 = vmatpush3.bf16.msra.mxu0 %v10401_v19 }
 0x33b   :  { %9789 = vmatprep.subr.bf16.mxu1 %v10066_v0  ;;  %9933 = vmatprep.subr.bf16.mxu0 %v10066_v0 }
 0x33e   :  { %9791 = vmatpush3.bf16.msra.mxu1 %v10415_v30  ;;  %9935 = vmatpush3.bf16.msra.mxu0 %v10415_v30 }
 0x33f   :  { %9792 = vmatprep.subr.bf16.mxu1 %v10066_v0  ;;  %9936 = vmatprep.subr.bf16.mxu0 %v10066_v0 }
 0x342   :  { %9794 = vmatpush3.bf16.msra.mxu1 %v10423_v39  ;;  %9938 = vmatpush3.bf16.msra.mxu0 %v10423_v39 }
 0x343   :  { %9795 = vmatprep.subr.bf16.mxu1 %v10066_v0  ;;  %9939 = vmatprep.subr.bf16.mxu0 %v10066_v0 }
 0x345   :  { %8420 = vmatmul.mubr.f32.vlgmr.msra.gmra.mrb[8].mxu1 %v11314_v14  ;;  %8630 = vmatmul.mubr.f32.vlgmr.msra.gmra.mrb[8].mxu0 %v11316_v40 }
 0x346   :  { %9797 = vmatpush3.bf16.msra.mxu1 %v10125_v12  ;;  %9941 = vmatpush3.bf16.msra.mxu0 %v10125_v12  ;;  %v4551_v12 = vmin.f32 %v11097_v49, 1e+08 }
 0x347   :  { %9798 = vmatprep.subr.bf16.mxu1 %v10066_v0  ;;  %9942 = vmatprep.subr.bf16.mxu0 %v10066_v0 }
 0x348   :  { %8454 = vmatprep.mubr.msk.f32.mxu1 %vm10067_vm0, %v10068_v8  ;;  %8664 = vmatprep.mubr.msk.f32.mxu0 %vm10067_vm0, %v10068_v8  ;;  %v3905_v8 = vmin.f32 %v11358_v48, 1e+08 }
 0x34a   :  { %9800 = vmatpush3.bf16.msra.mxu1 %v10129_v13  ;;  %9944 = vmatpush3.bf16.msra.mxu0 %v10129_v13 }
 0x34b   :  { %9801 = vmatprep.subr.bf16.mxu1 %v10066_v0  ;;  %9945 = vmatprep.subr.bf16.mxu0 %v10066_v0 }
 0x34e   :  { %9803 = vmatpush3.bf16.msra.mxu1 %v10148_v18  ;;  %9947 = vmatpush3.bf16.msra.mxu0 %v10148_v18 }
 0x34f   :  { %9804 = vmatprep.subr.bf16.mxu1 %v10066_v0  ;;  %9948 = vmatprep.subr.bf16.mxu0 %v10066_v0 }
 0x352   :  { %9806 = vmatpush3.bf16.msra.mxu1 %v10175_v25  ;;  %9950 = vmatpush3.bf16.msra.mxu0 %v10175_v25  ;;  %v3261_v25 = vand.u32 2147483647, %v11333_v62 }
 0x353   :  { %9807 = vmatprep.subr.bf16.mxu1 %v10066_v0  ;;  %9951 = vmatprep.subr.bf16.mxu0 %v10066_v0 }
 0x354   :  { %v5846_v15 = vsub.f32 1.0, %v3261_v25 }
 0x356   :  { %9809 = vmatpush3.bf16.msra.mxu1 %v10200_v32  ;;  %9953 = vmatpush3.bf16.msra.mxu0 %v10200_v32 }
 0x357   :  { %9810 = vmatprep.subr.bf16.mxu1 %v10066_v0  ;;  %9954 = vmatprep.subr.bf16.mxu0 %v10066_v0 }
 0x35a   :  { %9812 = vmatpush3.bf16.msra.mxu1 %v10239_v44  ;;  %9956 = vmatpush3.bf16.msra.mxu0 %v10239_v44 }
 0x35b   :  { %9813 = vmatprep.subr.bf16.mxu1 %v10066_v0  ;;  %9957 = vmatprep.subr.bf16.mxu0 %v10066_v0 }
 0x35e   :  { %9815 = vmatpush3.bf16.msra.mxu1 %v10258_v51  ;;  %9959 = vmatpush3.bf16.msra.mxu0 %v10258_v51 }
 0x35f   :  { %9816 = vmatprep.subr.bf16.mxu1 %v10066_v0  ;;  %9960 = vmatprep.subr.bf16.mxu0 %v10066_v0 }
 0x362   :  { %9818 = vmatpush3.bf16.msra.mxu1 %v10280_v60  ;;  %9962 = vmatpush3.bf16.msra.mxu0 %v10280_v60 }
 0x365   :  { %8455 = vmatmul.mubr.f32.vlgmr.msra.gmra.mrb[8].mxu1 %v11314_v14  ;;  %8665 = vmatmul.mubr.f32.vlgmr.msra.gmra.mrb[8].mxu0 %v11316_v40 }
 0x378   :  { %v3900_v13 = vpop.f32.mrb[6].mxu1  ;;  %v4546_v18 = vpop.f32.mrb[6].mxu0 }
 0x379   :  { %v3906_v32 = vmul.f32 %v3905_v8, %v3900_v13  ;;  %v4552_v44 = vmul.f32 %v4551_v12, %v4546_v18  ;;  %v8036_v51 = vpop.f32.mrb[7].mxu1  ;;  %v8246_v0 = vpop.f32.mrb[7].mxu0 }
 0x37b   :  { %v3907_v5 = vand.u32 2147483647, %v3906_v32  ;;  %v4553_v23 = vand.u32 2147483647, %v4552_v44 }
 0x37d   :  { %v5847_v20 = vsub.f32 1.0, %v3907_v5 }
 0x37f   :  { %v5848_v60 = vadd.f32 %v5847_v20, %v5846_v15 }
 0x438   :  { %v5192_v34 = vpop.f32.mrb[8].mxu1  ;;  %v5838_v59 = vpop.f32.mrb[8].mxu0 }
 0x439   :  { %v5198_v35 = vmul.f32 %v5197_v46, %v5192_v34  ;;  %v5844_v9 = vmul.f32 %v5843_v28, %v5838_v59  ;;  %v8456_v41 = vpop.f32.mrb[9].mxu1  ;;  %v8666_v19 = vpop.f32.mrb[9].mxu0 }
 0x43b   :  { %v5199_v53 = vand.u32 2147483647, %v5198_v35  ;;  %v5845_v55 = vand.u32 2147483647, %v5844_v9 }
 0x43d   :  { %v5849_v30 = vadd.f32 %v5199_v53, %v4553_v23 }
 0x43f   :  { %v5850_v39 = vadd.f32 %v5849_v30, %v5845_v55 }
 0x441   :  { %v5851_v56 = vmul.f32 0.5, %v5850_v39 }
 0x443   :  { %v5852_v61 = vadd.f32 %v5851_v56, %v5848_v60 }
 0x445   :  { %5854 = vst.msk [vmem:[%s11564_s5] sm:$0xff] %vm5853_vm1, %v5852_v61 }

</bundles_post_ra>
